<compile_context>
chip_gen: v7x
topology: tpu7x:2x2x1
jax: 0.10.0
libtpu: 0.0.40
codegen_flags: <defaults>
</compile_context>

<pallas_src>
import functools

import jax
import jax.numpy as jnp
from jax import lax
from jax.experimental import pallas as pl
from jax.experimental.pallas import tpu as pltpu


# ------------------------------------------------------------------ config ---
class Config:
    input_dim = 3
    n_embd = 32
    tod_embedding_dim = 8
    dow_embedding_dim = 8
    spatial_embedding_dim = 8
    adaptive_embedding_dim = 8
    steps_per_day = 24
    num_nodes = 16
    seq_len = 8

    @property
    def output_dim(self):
        return (self.n_embd + self.tod_embedding_dim + self.dow_embedding_dim
                + self.spatial_embedding_dim + self.adaptive_embedding_dim)


N_DOW = 7
LANE_PAD = 128          # padded output width -> lane-dense (unmasked) stores


# ------------------------------------------------------------------ kernel ---
def stae_kernel(x_ref, w_ref, add_ref, out_ref, *, input_dim, steps_per_day):
    # x_ref:   (rows, C)    raw feature slab (main | tod_frac | dow)
    # w_ref:   (34, 128)    block-diag(W, tod_table, dow_table), N padded to 128
    # add_ref: (rows, 128)  precomputed [bias | 0 | spatial | adaptive | 0]
    # out_ref: (rows, 128)  lane-dense output; cols >= 64 are zero padding
    x = x_ref[...]                                            # (rows, C)
    rows, c_in = x.shape
    k_fused = input_dim + steps_per_day + N_DOW               # 34

    col = lax.broadcasted_iota(jnp.int32, (rows, k_fused), 1)

    # Keepdims lane slices -> compare directly against the shifted 2-D iota.
    tod_idx = jnp.clip(
        (x[:, input_dim:input_dim + 1] * steps_per_day).astype(jnp.int32),
        0, steps_per_day - 1)                                 # (rows, 1)
    dow_idx = jnp.clip(
        x[:, input_dim + 1:input_dim + 2].astype(jnp.int32),
        0, N_DOW - 1)                                         # (rows, 1)

    # Two-hot block landing at lanes [3, 27) (tod) and [27, 34) (dow).
    two_hot = ((col == tod_idx + input_dim) |
               (col == dow_idx + (input_dim + steps_per_day))
               ).astype(jnp.float32)                          # (rows, 34)

    # Build the fused MXU operand in place: lanes [0, 3) come from x, the rest
    # from the two-hot.  Tail-padding x keeps every value at its lane offset.
    x_pad = jnp.concatenate(
        [x, jnp.zeros((rows, k_fused - c_in), jnp.float32)], axis=-1)
    xin = jnp.where(col < input_dim, x_pad, two_hot)          # (rows, 34)

    out = jnp.dot(xin, w_ref[...],
                  preferred_element_type=jnp.float32,
                  precision=jax.lax.Precision.HIGHEST) + add_ref[...]
    out_ref[...] = out.astype(out_ref.dtype)


# ------------------------------------------------- constants (built once) ---
def build_stae_constants(params, cfg: Config, B, T, N):
    """Per-parameter-set constants; hoisted out of the per-call hot path."""
    TN = T * N
    rows = B * TN
    k_fused = cfg.input_dim + cfg.steps_per_day + N_DOW       # 34

    # Fused block-diagonal weight, N padded 64 -> 128 (zero columns 64:128).
    w = jnp.zeros((k_fused, LANE_PAD), jnp.float32)
    r, c = 0, 0
    w = w.at[r:r + cfg.input_dim, c:c + cfg.n_embd].set(params["W"])
    r += cfg.input_dim
    c += cfg.n_embd
    w = w.at[r:r + cfg.steps_per_day,
             c:c + cfg.tod_embedding_dim].set(params["tod_table"])
    r += cfg.steps_per_day
    c += cfg.tod_embedding_dim
    w = w.at[r:r + N_DOW, c:c + cfg.dow_embedding_dim].set(params["dow_table"])
    c += cfg.dow_embedding_dim

    # Additive operand: [bias(32) | 0(16) | spatial(8) | adaptive(8) | 0(64)].
    add = jnp.zeros((rows, LANE_PAD), jnp.float32)
    add = add.at[:, :cfg.n_embd].set(params["b"])
    spa_rows = jnp.tile(params["node_emb"], (B * T, 1))                 # (rows, 8)
    adp_rows = jnp.tile(
        params["adaptive"].reshape(TN, cfg.adaptive_embedding_dim), (B, 1))
    add = add.at[:, c:c + cfg.spatial_embedding_dim].set(spa_rows)
    c += cfg.spatial_embedding_dim
    add = add.at[:, c:c + cfg.adaptive_embedding_dim].set(adp_rows)

    return w, add


def pick_num_row_blocks(total_rows, rows_per_block=128):
    # v5e/v6e: single TensorCore -> one grid step (no per-step pipeline cost).
    # v7x: 2 TensorCores -> split the rows in two "parallel" blocks.
    try:
        kind = jax.devices()[0].device_kind.lower()
    except Exception:
        kind = ""
    if "v7" in kind and total_rows % (2 * rows_per_block) == 0:
        return 2
    return 1


# ----------------------------------------------------------------- wrapper ---
def stae_forward(x, w_fused, add_op, *, cfg: Config, num_row_blocks):
    B, T, N, C = x.shape
    rows = B * T * N
    out_dim = cfg.output_dim
    n_pad = w_fused.shape[1]                                  # 128

    assert rows % num_row_blocks == 0
    rows_blk = rows // num_row_blocks
    assert rows_blk % 8 == 0

    x_flat = x.reshape(rows, C)                               # pure reshape

    kernel = functools.partial(stae_kernel,
                               input_dim=cfg.input_dim,
                               steps_per_day=cfg.steps_per_day)

    out = pl.pallas_call(
        kernel,
        out_shape=jax.ShapeDtypeStruct((rows, n_pad), jnp.float32),
        grid_spec=pltpu.PrefetchScalarGridSpec(
            num_scalar_prefetch=0,
            grid=(num_row_blocks,),
            in_specs=[
                pl.BlockSpec((rows_blk, C), lambda i: (i, 0)),
                pl.BlockSpec(w_fused.shape, lambda i: (0, 0)),   # fetched once
                pl.BlockSpec((rows_blk, n_pad), lambda i: (i, 0)),
            ],
            out_specs=pl.BlockSpec((rows_blk, n_pad), lambda i: (i, 0)),
        ),
        compiler_params=pltpu.CompilerParams(
            dimension_semantics=("parallel",)),
    )(x_flat, w_fused, add_op)

    return out[:, :out_dim].reshape(B, T, N, out_dim)


# -------------------------------------------------------- pure-JAX reference -
def stae_reference(x, params, cfg: Config):
    B, T, N, _ = x.shape
    main = jnp.einsum("btni,io->btno", x[..., :cfg.input_dim], params["W"],
                      precision=jax.lax.Precision.HIGHEST) + params["b"]
    tod_idx = jnp.clip((x[..., cfg.input_dim] * cfg.steps_per_day)
                       .astype(jnp.int32), 0, cfg.steps_per_day - 1)
    tod = params["tod_table"][tod_idx]
    dow_idx = jnp.clip(x[..., cfg.input_dim + 1].astype(jnp.int32), 0, N_DOW - 1)
    dow = params["dow_table"][dow_idx]
    spa = jnp.broadcast_to(params["node_emb"][None, None],
                           (B, T, N, cfg.spatial_embedding_dim))
    adp = jnp.broadcast_to(params["adaptive"][None],
                           (B, T, N, cfg.adaptive_embedding_dim))
    return jnp.concatenate([main, tod, dow, spa, adp], axis=-1)


# -------------------------------------------------------------------- main ---
if __name__ == "__main__":
    cfg = Config()
    key = jax.random.PRNGKey(0)
    k = jax.random.split(key, 8)

    B, T, N = 2, cfg.seq_len, cfg.num_nodes
    C = cfg.input_dim + 2  # main features + tod feature + dow feature

    # Deterministic parameter init (synthetic; matches module __init__ shapes).
    params = {
        "W": jax.random.normal(k[0], (cfg.input_dim, cfg.n_embd),
                               jnp.float32) * 0.1,
        "b": jax.random.normal(k[1], (cfg.n_embd,), jnp.float32) * 0.1,
        "tod_table": jax.random.normal(
            k[2], (cfg.steps_per_day, cfg.tod_embedding_dim), jnp.float32),
        "dow_table": jax.random.normal(
            k[3], (N_DOW, cfg.dow_embedding_dim), jnp.float32),
        "node_emb": jax.random.uniform(
            k[4], (cfg.num_nodes, cfg.spatial_embedding_dim),
            jnp.float32, -0.5, 0.5),
        "adaptive": jax.random.uniform(
            k[5], (cfg.seq_len, cfg.num_nodes, cfg.adaptive_embedding_dim),
            jnp.float32, -0.5, 0.5),
    }

    # Input: main channels ~ N(0,1); tod feature in [0,1); dow feature 0..6.
    main_feat = jax.random.normal(k[6], (B, T, N, cfg.input_dim), jnp.float32)
    tod_feat = jax.random.uniform(k[7], (B, T, N, 1), jnp.float32)
    dow_feat = jax.random.randint(
        jax.random.fold_in(key, 99), (B, T, N, 1), 0, 7).astype(jnp.float32)
    x = jnp.concatenate([main_feat, tod_feat, dow_feat], axis=-1)
    assert x.shape == (B, T, N, C)

    # Constants built once per parameter set (hoisted out of the hot path).
    w_fused, add_op = build_stae_constants(params, cfg, B, T, N)
    w_fused = jax.block_until_ready(w_fused)
    add_op = jax.block_until_ready(add_op)

    nb = pick_num_row_blocks(B * T * N)
    fwd = jax.jit(functools.partial(stae_forward, cfg=cfg, num_row_blocks=nb))

    out = jax.block_until_ready(fwd(x, w_fused, add_op))

    ref = stae_reference(x, params, cfg)
    assert out.shape == (B, T, N, cfg.output_dim)
    assert jnp.max(jnp.abs(out - ref)) < 1e-4

    print("KERNEL_OK")
</pallas_src>

<mosaic_0001>
module attributes {stable_mosaic.version = 11 : i64} {
  func.func @stae_kernel(%arg0: i32, %arg1: memref<256x5xf32, #tpu.memory_space<vmem>>, %arg2: memref<34x128xf32, #tpu.memory_space<vmem>>, %arg3: memref<256x128xf32, #tpu.memory_space<vmem>>, %arg4: memref<256x128xf32, #tpu.memory_space<vmem>>) attributes {dimension_semantics = [#tpu.dimension_semantics<parallel>], iteration_bounds = array<i64: 1>, scalar_prefetch = 0 : i64, scratch_operands = 0 : i64, tpu.core_type = #tpu.core_type<tc>, window_params = [{transform_indices = @transform_0, window_bounds = array<i64: 256, 5>}, {pipeline_mode = #tpu.pipeline_mode<synchronous>, transform_indices = @transform_1, window_bounds = array<i64: 34, 128>}, {transform_indices = @transform_2, window_bounds = array<i64: 256, 128>}, {transform_indices = @transform_3, window_bounds = array<i64: 256, 128>}]} {
    %c0 = arith.constant 0 : index
    %c0_0 = arith.constant 0 : index
    %0 = vector.load %arg1[%c0, %c0_0] : memref<256x5xf32, #tpu.memory_space<vmem>>, vector<256x5xf32>
    %1 = tpu.iota {dimensions = array<i32: 1>} : vector<256x34xi32>
    %2 = vector.extract_strided_slice %0 {offsets = [0, 3], sizes = [256, 1], strides = [1, 1]} : vector<256x5xf32> to vector<256x1xf32>
    %cst = arith.constant 2.400000e+01 : f32
    %3 = vector.broadcast %cst : f32 to vector<256x1xf32>
    %4 = arith.mulf %2, %3 : vector<256x1xf32>
    %5 = arith.fptosi %4 : vector<256x1xf32> to vector<256x1xi32>
    %c0_i32 = arith.constant 0 : i32
    %c23_i32 = arith.constant 23 : i32
    %6 = vector.broadcast %c0_i32 : i32 to vector<256x1xi32>
    %7 = arith.maxsi %6, %5 : vector<256x1xi32>
    %8 = vector.broadcast %c23_i32 : i32 to vector<256x1xi32>
    %9 = arith.minsi %8, %7 : vector<256x1xi32>
    %10 = vector.extract_strided_slice %0 {offsets = [0, 4], sizes = [256, 1], strides = [1, 1]} : vector<256x5xf32> to vector<256x1xf32>
    %11 = arith.fptosi %10 : vector<256x1xf32> to vector<256x1xi32>
    %c0_i32_1 = arith.constant 0 : i32
    %c6_i32 = arith.constant 6 : i32
    %12 = vector.broadcast %c0_i32_1 : i32 to vector<256x1xi32>
    %13 = arith.maxsi %12, %11 : vector<256x1xi32>
    %14 = vector.broadcast %c6_i32 : i32 to vector<256x1xi32>
    %15 = arith.minsi %14, %13 : vector<256x1xi32>
    %c3_i32 = arith.constant 3 : i32
    %16 = vector.broadcast %c3_i32 : i32 to vector<256x1xi32>
    %17 = arith.addi %9, %16 : vector<256x1xi32>
    %18 = vector.broadcast %17 : vector<256x1xi32> to vector<256x34xi32>
    %19 = arith.cmpi eq, %1, %18 : vector<256x34xi32>
    %c27_i32 = arith.constant 27 : i32
    %20 = vector.broadcast %c27_i32 : i32 to vector<256x1xi32>
    %21 = arith.addi %15, %20 : vector<256x1xi32>
    %22 = vector.broadcast %21 : vector<256x1xi32> to vector<256x34xi32>
    %23 = arith.cmpi eq, %1, %22 : vector<256x34xi32>
    %24 = arith.ori %19, %23 : vector<256x34xi1>
    %25 = arith.extui %24 : vector<256x34xi1> to vector<256x34xi32>
    %26 = arith.sitofp %25 : vector<256x34xi32> to vector<256x34xf32>
    %cst_2 = arith.constant 0.000000e+00 : f32
    %27 = vector.broadcast %cst_2 : f32 to vector<256x29xf32>
    %28 = tpu.concatenate %0, %27 in 1 : vector<256x5xf32>, vector<256x29xf32> -> vector<256x34xf32>
    %c3_i32_3 = arith.constant 3 : i32
    %29 = vector.broadcast %c3_i32_3 : i32 to vector<256x34xi32>
    %30 = arith.cmpi slt, %1, %29 : vector<256x34xi32>
    %31 = arith.select %30, %28, %26 : vector<256x34xi1>, vector<256x34xf32>
    %c0_4 = arith.constant 0 : index
    %c0_5 = arith.constant 0 : index
    %32 = vector.load %arg2[%c0_4, %c0_5] : memref<34x128xf32, #tpu.memory_space<vmem>>, vector<34x128xf32>
    %cst_6 = arith.constant dense<0.000000e+00> : vector<256x128xf32>
    %33 = tpu.matmul %31, %32, %cst_6 {dimension_numbers = #tpu.dot_dimension_numbers<[1], [0], [0], [1], [0, 0, 1, 1], [], []>, precision = #tpu.contract_precision<fp32>} : vector<256x34xf32>, vector<34x128xf32>, vector<256x128xf32> -> vector<256x128xf32>
    %c0_7 = arith.constant 0 : index
    %c0_8 = arith.constant 0 : index
    %34 = vector.load %arg3[%c0_7, %c0_8] : memref<256x128xf32, #tpu.memory_space<vmem>>, vector<256x128xf32>
    %35 = arith.addf %33, %34 : vector<256x128xf32>
    %c0_9 = arith.constant 0 : index
    %c0_10 = arith.constant 0 : index
    %36 = vector.load %arg4[%c0_9, %c0_10] : memref<256x128xf32, #tpu.memory_space<vmem>>, vector<256x128xf32>
    tpu.vector_store %arg4[%c0_9, %c0_10], %35 {strides = array<i32>} : memref<256x128xf32, #tpu.memory_space<vmem>>, vector<256x128xf32>,
    return
  }
  func.func @transform_0(%arg0: i32) -> (i32, i32) {
    %c0_i32 = arith.constant 0 : i32
    %c0_i32_0 = arith.constant 0 : i32
    return %arg0, %c0_i32 : i32, i32
  }
  func.func @transform_1(%arg0: i32) -> (i32, i32) {
    %c0_i32 = arith.constant 0 : i32
    %c0_i32_0 = arith.constant 0 : i32
    %c0_i32_1 = arith.constant 0 : i32
    return %c0_i32, %c0_i32_0 : i32, i32
  }
  func.func @transform_2(%arg0: i32) -> (i32, i32) {
    %c0_i32 = arith.constant 0 : i32
    %c0_i32_0 = arith.constant 0 : i32
    return %arg0, %c0_i32 : i32, i32
  }
  func.func @transform_3(%arg0: i32) -> (i32, i32) {
    %c0_i32 = arith.constant 0 : i32
    %c0_i32_0 = arith.constant 0 : i32
    return %arg0, %c0_i32 : i32, i32
  }
}

</mosaic_0001>

<bundles_post_ra>
// kernel: stae_forward.1
= control target key start
LH: loop header
LB: loop body
LE: loop exit
PB: predicated region body
PF: predicated region fallthrough
CT: control target
= control target key end

     0   :  { %v3924_v3 = vmov 4   ;;  %s5008_s0 = inlined_call_operand.vmem [shape: f32[256,5], index: 0, kind: input, shape index: {}]   ;;  %s5009_s1 = inlined_call_operand.vmem [shape: f32[34,128], index: 1, kind: input, shape index: {}]   ;;  %s5010_s2 = inlined_call_operand.vmem [shape: f32[256,128], index: 2, kind: input, shape index: {}]   ;;  %s5011_s3 = inlined_call_operand.hbm [shape: f32[256,128], index: 3, kind: output, shape index: {}]  }
   0x1   :  { %v16_v0 = vld [vmem:[%s5008_s0 + $0x8] sm:$0xff]  ;;  %v15_v1 = vld [vmem:[%s5008_s0] sm:$0xff]  ;;  %v17_v2 = vld [vmem:[%s5008_s0 + $0x10] sm:$0xff]  ;;  %3877 = vset.pattern.permute.xlu1 %v3924_v3  ;;  %3876 = vset.pattern.permute.xlu0 %v3924_v3 }
   0x2   :  { %v3808_v4 = vtrunc.f32 %v16_v0  ;;  %v3806_v5 = vtrunc.f32 %v15_v1  ;;  %v3810_v6 = vtrunc.f32 %v17_v2  ;;  %v50_v7 = vmul.f32 24.0, %v16_v0  ;;  %v18_v8 = vld [vmem:[%s5008_s0 + $0x18] sm:$0xff]  ;;  %v19_v30 = vld [vmem:[%s5008_s0 + $0x20] sm:$0xff] }
   0x3   :  { %v51_v9 = vmul.f32 24.0, %v17_v2  ;;  %v49_v10 = vmul.f32 24.0, %v15_v1  ;;  %v52_v11 = vmul.f32 24.0, %v18_v8  ;;  %v3812_v12 = vtrunc.f32 %v18_v8 }
   0x4   :  { %v3809_v13 = vcvt.f32.s32 %v3808_v4  ;;  %v3807_v14 = vcvt.f32.s32 %v3806_v5  ;;  %v3811_v15 = vcvt.f32.s32 %v3810_v6  ;;  %v3744_v16 = vtrunc.f32 %v50_v7 }
   0x5   :  { %v3746_v17 = vtrunc.f32 %v51_v9  ;;  %v3742_v18 = vtrunc.f32 %v49_v10  ;;  %v3748_v19 = vtrunc.f32 %v52_v11  ;;  %v3813_v20 = vcvt.f32.s32 %v3812_v12 }
   0x6   :  { %vm275_vm0 = vcmp.gt.s32.totalorder %v3809_v13, 0  ;;  %vm273_vm1 = vcmp.gt.s32.totalorder %v3807_v14, 0  ;;  %vm277_vm2 = vcmp.gt.s32.totalorder %v3811_v15, 0  ;;  %v3745_v21 = vcvt.f32.s32 %v3744_v16 }
   0x7   :  { %v276_v22 = vsel %vm275_vm0, %v3809_v13, 0  ;;  %v274_v23 = vsel %vm273_vm1, %v3807_v14, 0  ;;  %v278_v24 = vsel %vm277_vm2, %v3811_v15, 0  ;;  %v3747_v25 = vcvt.f32.s32 %v3746_v17 }
   0x8   :  { %vm339_vm3 = vcmp.lt.s32.totalorder %v276_v22, 6  ;;  %vm337_vm4 = vcmp.lt.s32.totalorder %v274_v23, 6  ;;  %vm341_vm5 = vcmp.lt.s32.totalorder %v278_v24, 6  ;;  %vm115_vm6 = vcmp.gt.s32.totalorder %v3745_v21, 0 }
   0x9   :  { %v340_v26 = vsel %vm339_vm3, %v276_v22, 6  ;;  %v338_v27 = vsel %vm337_vm4, %v274_v23, 6  ;;  %v342_v28 = vsel %vm341_vm5, %v278_v24, 6  ;;  %v116_v29 = vsel %vm115_vm6, %v3745_v21, 0 }
   0xa   :  { %v562_v31 = vadd.s32 27, %v340_v26  ;;  %v561_v32 = vadd.s32 27, %v338_v27  ;;  %v563_v33 = vadd.s32 27, %v342_v28  ;;  %vm179_vm7 = vcmp.lt.s32.totalorder %v116_v29, 23 }
   0xb   :  { %v180_v34 = vsel %vm179_vm7, %v116_v29, 23  ;;  %vm117_vm8 = vcmp.gt.s32.totalorder %v3747_v25, 0  ;;  %v3743_v35 = vcvt.f32.s32 %v3742_v18  ;;  %v3749_v36 = vcvt.f32.s32 %v3748_v19 }
   0xc   :  { %597 = vperm.xlu1 %3877, %v562_v31   ;;  %594 = vperm.xlu0 %3876, %v561_v32   ;;  %v402_v37 = vadd.s32 3, %v180_v34  ;;  %v118_v38 = vsel %vm117_vm8, %v3747_v25, 0  ;;  %vm279_vm9 = vcmp.gt.s32.totalorder %v3813_v20, 0  ;;  %v53_v39 = vmul.f32 24.0, %v19_v30 }
   0xd   :  { %vm181_vm10 = vcmp.lt.s32.totalorder %v118_v38, 23  ;;  %vm113_vm11 = vcmp.gt.s32.totalorder %v3743_v35, 0  ;;  %vm119_vm12 = vcmp.gt.s32.totalorder %v3749_v36, 0  ;;  %v280_v40 = vsel %vm279_vm9, %v3813_v20, 0 }
   0xe   :  { %8 = vsyncpa [#allocation3], 0  ;;  %v182_v41 = vsel %vm181_vm10, %v118_v38, 23  ;;  %v114_v42 = vsel %vm113_vm11, %v3743_v35, 0  ;;  %v120_v43 = vsel %vm119_vm12, %v3749_v36, 0  ;;  %vm343_vm13 = vcmp.lt.s32.totalorder %v280_v40, 6 }
   0xf   :  { %v20_v44 = vld [vmem:[%s5008_s0 + $0x28] sm:$0xff]  ;;  %vm177_vm14 = vcmp.lt.s32.totalorder %v114_v42, 23  ;;  %vm183_vm15 = vcmp.lt.s32.totalorder %v120_v43, 23  ;;  %v344_v45 = vsel %vm343_vm13, %v280_v40, 6  ;;  %v21_v46 = vld [vmem:[%s5008_s0 + $0x30] sm:$0xff]  ;;  %v3925_v47 = vmov 3  }
  0x10   :  { %3880 = vset.pattern.permute.xlu1 %v3925_v47  ;;  %600 = vperm.xlu0 %3876, %v563_v33   ;;  %v403_v48 = vadd.s32 3, %v182_v41  ;;  %v178_v49 = vsel %vm177_vm14, %v114_v42, 23  ;;  %v184_v50 = vsel %vm183_vm15, %v120_v43, 23  ;;  %v3750_v51 = vtrunc.f32 %v53_v39  ;;  %v22_v52 = vld [vmem:[%s5008_s0 + $0x38] sm:$0xff]  ;;  %v23_v17 = vld [vmem:[%s5008_s0 + $0x40] sm:$0xff]  ;;  %v24_v25 = vld [vmem:[%s5008_s0 + $0x48] sm:$0xff] }
  0x11   :  { %437 = vperm.xlu1 %3880, %v402_v37   ;;  %v401_v53 = vadd.s32 3, %v178_v49  ;;  %v564_v54 = vadd.s32 27, %v344_v45  ;;  %v3814_v55 = vtrunc.f32 %v19_v30  ;;  %v54_v56 = vmul.f32 24.0, %v20_v44  ;;  %v25_v38 = vld [vmem:[%s5008_s0 + $0x50] sm:$0xff]  ;;  %s3927_s19 = smov [#allocation2]  }
  0x12   :  { %v3751_v57 = vcvt.f32.s32 %v3750_v51  ;;  %v3816_v58 = vtrunc.f32 %v20_v44  ;;  %v55_v59 = vmul.f32 24.0, %v21_v46  ;;  %v3818_v60 = vtrunc.f32 %v21_v46  ;;  %s2889_s20 = sshll.u32 %s3927_s19, 4  ;;  %s2890_s20 = int_to_ptr.vmem [resolvable:$true] %s2889_s20 }
  0x13   :  { %v404_v61 = vadd.s32 3, %v184_v50  ;;  %v3815_v62 = vcvt.f32.s32 %v3814_v55  ;;  %v3752_v63 = vtrunc.f32 %v54_v56  ;;  %v56_v0 = vmul.f32 24.0, %v22_v52  ;;  %v26_v50 = vld [vmem:[%s5008_s0 + $0x58] sm:$0xff]  ;;  %s3900_s21 = scalar_lea.vmem %s2890_s20, 4096  ;;  %p3905_p1 = scmp.lt.s32.totalorder %s2890_s20, %s2890_s20 }
  0x14   :  { %3878 = vset.pattern.permute.xlu0 %v3925_v47  ;;  %vm121_vm0 = vcmp.gt.s32.totalorder %v3751_v57, 0  ;;  %v3817_v1 = vcvt.f32.s32 %v3816_v58  ;;  %v3754_v2 = vtrunc.f32 %v55_v59  ;;  %v3819_v4 = vcvt.f32.s32 %v3818_v60  ;;  %p3901_p0 = scmp.ne.s32.totalorder %s2890_s20, %s3900_s21  ;;  %p3906_p2 = scmp.lt.s32.totalorder %s3900_s21, %s3900_s21 }
  0x15   :  { %440 = vperm.xlu1 %3880, %v403_v48   ;;  %434 = vperm.xlu0 %3878, %v401_v53   ;;  %v122_v5 = vsel %vm121_vm0, %v3751_v57, 0  ;;  %vm281_vm1 = vcmp.gt.s32.totalorder %v3815_v62, 0  ;;  %v3753_v6 = vcvt.f32.s32 %v3752_v63  ;;  %v3756_v7 = vtrunc.f32 %v56_v0  ;;  %v27_v57 = vld [vmem:[%s5008_s0 + $0x60] sm:$0xff] }
  0x16   :  { %vm185_vm2 = vcmp.lt.s32.totalorder %v122_v5, 23  ;;  %v282_v8 = vsel %vm281_vm1, %v3815_v62, 0  ;;  %vm283_vm3 = vcmp.gt.s32.totalorder %v3817_v1, 0  ;;  %v3755_v9 = vcvt.f32.s32 %v3754_v2  ;;  %p3907_p3 = por %p3906_p2, %p3905_p1 }
  0x17   :  { %v186_v10 = vsel %vm185_vm2, %v122_v5, 23  ;;  %vm345_vm4 = vcmp.lt.s32.totalorder %v282_v8, 6  ;;  %vm123_vm5 = vcmp.gt.s32.totalorder %v3753_v6, 0  ;;  %v284_v11 = vsel %vm283_vm3, %v3817_v1, 0 }
  0x18   :  { %v346_v12 = vsel %vm345_vm4, %v282_v8, 6  ;;  %v124_v13 = vsel %vm123_vm5, %v3753_v6, 0  ;;  %vm347_vm6 = vcmp.lt.s32.totalorder %v284_v11, 6  ;;  %v3820_v14 = vtrunc.f32 %v22_v52  ;;  %p3908_p4 = pnand %p3907_p3, %p3901_p0 }
  0x19   :  { %443 = vperm.xlu1 %3880, %v404_v61   ;;  %3879 = vset.pattern.permute.xlu0 %v3924_v3  ;;  %v405_v15 = vadd.s32 3, %v186_v10  ;;  %vm187_vm7 = vcmp.lt.s32.totalorder %v124_v13, 23  ;;  %v348_v16 = vsel %vm347_vm6, %v284_v11, 6  ;;  %vm125_vm8 = vcmp.gt.s32.totalorder %v3755_v9, 0 }
  0x1a   :  { %603 = vperm.xlu0 %3879, %v564_v54   ;;  %v565_v18 = vadd.s32 27, %v346_v12  ;;  %v188_v19 = vsel %vm187_vm7, %v124_v13, 23  ;;  %v126_v20 = vsel %vm125_vm8, %v3755_v9, 0  ;;  %vm285_vm9 = vcmp.gt.s32.totalorder %v3819_v4, 0  ;;  %v28_v13 = vld [vmem:[%s5008_s0 + $0x68] sm:$0xff] }
  0x1b   :  { %vm189_vm10 = vcmp.lt.s32.totalorder %v126_v20, 23  ;;  %v286_v21 = vsel %vm285_vm9, %v3819_v4, 0  ;;  %v3757_v22 = vcvt.f32.s32 %v3756_v7  ;;  %v566_v23 = vadd.s32 27, %v348_v16 }
  0x1c   :  { %vm349_vm11 = vcmp.lt.s32.totalorder %v286_v21, 6  ;;  %v3821_v24 = vcvt.f32.s32 %v3820_v14  ;;  %v57_v3 = vmul.f32 24.0, %v23_v17  ;;  %v406_v26 = vadd.s32 3, %v188_v19 }
  0x1d   :  { %446 = vperm.xlu1 %3880, %v405_v15   ;;  %v190_v27 = vsel %vm189_vm10, %v126_v20, 23  ;;  %vm127_vm12 = vcmp.gt.s32.totalorder %v3757_v22, 0  ;;  %v3822_v28 = vtrunc.f32 %v23_v17  ;;  %v350_v29 = vsel %vm349_vm11, %v286_v21, 6 }
  0x1e   :  { %606 = vperm.xlu0 %3879, %v565_v18   ;;  %v128_v30 = vsel %vm127_vm12, %v3757_v22, 0  ;;  %vm287_vm13 = vcmp.gt.s32.totalorder %v3821_v24, 0  ;;  %v3758_v31 = vtrunc.f32 %v57_v3  ;;  %v58_v34 = vmul.f32 24.0, %v24_v25  ;;  %v29_v22 = vld [vmem:[%s5008_s0 + $0x70] sm:$0xff] }
  0x1f   :  { %vm191_vm14 = vcmp.lt.s32.totalorder %v128_v30, 23  ;;  %v288_v32 = vsel %vm287_vm13, %v3821_v24, 0  ;;  %v3823_v33 = vcvt.f32.s32 %v3822_v28  ;;  %v407_v35 = vadd.s32 3, %v190_v27  ;;  %v30_v28 = vld [vmem:[%s5008_s0 + $0x78] sm:$0xff] }
  0x20   :  { %vm351_vm15 = vcmp.lt.s32.totalorder %v288_v32, 6  ;;  %v3759_v36 = vcvt.f32.s32 %v3758_v31  ;;  %v3824_v37 = vtrunc.f32 %v24_v25  ;;  %v567_v39 = vadd.s32 27, %v350_v29 }
  0x21   :  { %449 = vperm.xlu1 %3880, %v406_v26   ;;  %v192_v40 = vsel %vm191_vm14, %v128_v30, 23  ;;  %vm289_vm0 = vcmp.gt.s32.totalorder %v3823_v33, 0  ;;  %v3760_v41 = vtrunc.f32 %v58_v34  ;;  %v352_v42 = vsel %vm351_vm15, %v288_v32, 6  ;;  %v31_v32 = vld [vmem:[%s5008_s0 + $0x80] sm:$0xff] }
  0x22   :  { %609 = vperm.xlu0 %3879, %v566_v23   ;;  %vm129_vm1 = vcmp.gt.s32.totalorder %v3759_v36, 0  ;;  %v290_v43 = vsel %vm289_vm0, %v3823_v33, 0  ;;  %v3825_v44 = vcvt.f32.s32 %v3824_v37  ;;  %v59_v47 = vmul.f32 24.0, %v25_v38 }
  0x23   :  { %v130_v45 = vsel %vm129_vm1, %v3759_v36, 0  ;;  %vm353_vm2 = vcmp.lt.s32.totalorder %v290_v43, 6  ;;  %v3761_v46 = vcvt.f32.s32 %v3760_v41  ;;  %v3826_v49 = vtrunc.f32 %v25_v38 }
  0x24   :  { %vm193_vm3 = vcmp.lt.s32.totalorder %v130_v45, 23  ;;  %v354_v48 = vsel %vm353_vm2, %v290_v43, 6  ;;  %vm291_vm4 = vcmp.gt.s32.totalorder %v3825_v44, 0  ;;  %v408_v51 = vadd.s32 3, %v192_v40 }
  0x25   :  { %452 = vperm.xlu1 %3880, %v407_v35   ;;  %v194_v52 = vsel %vm193_vm3, %v130_v45, 23  ;;  %vm131_vm5 = vcmp.gt.s32.totalorder %v3761_v46, 0  ;;  %v292_v53 = vsel %vm291_vm4, %v3825_v44, 0  ;;  %v568_v54 = vadd.s32 27, %v352_v42 }
  0x26   :  { %612 = vperm.xlu0 %3879, %v567_v39   ;;  %v132_v55 = vsel %vm131_vm5, %v3761_v46, 0  ;;  %vm355_vm6 = vcmp.lt.s32.totalorder %v292_v53, 6  ;;  %v3762_v56 = vtrunc.f32 %v59_v47  ;;  %v569_v58 = vadd.s32 27, %v354_v48 }
  0x27   :  { %vm195_vm7 = vcmp.lt.s32.totalorder %v132_v55, 23  ;;  %v3827_v59 = vcvt.f32.s32 %v3826_v49  ;;  %v60_v60 = vmul.f32 24.0, %v26_v50  ;;  %v409_v61 = vadd.s32 3, %v194_v52 }
  0x28   :  { %v356_v62 = vsel %vm355_vm6, %v292_v53, 6  ;;  %v3763_v63 = vcvt.f32.s32 %v3762_v56  ;;  %v3828_v0 = vtrunc.f32 %v26_v50  ;;  %v196_v1 = vsel %vm195_vm7, %v132_v55, 23 }
  0x29   :  { %455 = vperm.xlu1 %3880, %v408_v51   ;;  %vm293_vm8 = vcmp.gt.s32.totalorder %v3827_v59, 0  ;;  %v3764_v2 = vtrunc.f32 %v60_v60  ;;  %v61_v4 = vmul.f32 24.0, %v27_v57  ;;  %v3830_v7 = vtrunc.f32 %v27_v57  ;;  %v32_v57 = vld [vmem:[%s5008_s0 + $0x88] sm:$0xff] }
  0x2a   :  { %615 = vperm.xlu0 %3879, %v568_v54   ;;  %vm133_vm9 = vcmp.gt.s32.totalorder %v3763_v63, 0  ;;  %v294_v5 = vsel %vm293_vm8, %v3827_v59, 0  ;;  %v3829_v6 = vcvt.f32.s32 %v3828_v0  ;;  %v570_v11 = vadd.s32 27, %v356_v62 }
  0x2b   :  { %v134_v8 = vsel %vm133_vm9, %v3763_v63, 0  ;;  %vm357_vm10 = vcmp.lt.s32.totalorder %v294_v5, 6  ;;  %v3765_v9 = vcvt.f32.s32 %v3764_v2  ;;  %v3766_v10 = vtrunc.f32 %v61_v4 }
  0x2c   :  { %vm197_vm11 = vcmp.lt.s32.totalorder %v134_v8, 23  ;;  %vm295_vm12 = vcmp.gt.s32.totalorder %v3829_v6, 0  ;;  %v3831_v12 = vcvt.f32.s32 %v3830_v7  ;;  %v410_v14 = vadd.s32 3, %v196_v1 }
  0x2d   :  { %458 = vperm.xlu1 %3880, %v409_v61   ;;  %v358_v15 = vsel %vm357_vm10, %v294_v5, 6  ;;  %vm135_vm13 = vcmp.gt.s32.totalorder %v3765_v9, 0  ;;  %v296_v16 = vsel %vm295_vm12, %v3829_v6, 0  ;;  %v198_v17 = vsel %vm197_vm11, %v134_v8, 23  ;;  %v33_v6 = vld [vmem:[%s5008_s0 + $0x90] sm:$0xff] }
  0x2e   :  { %618 = vperm.xlu0 %3879, %v569_v58   ;;  %v136_v18 = vsel %vm135_vm13, %v3765_v9, 0  ;;  %vm359_vm14 = vcmp.lt.s32.totalorder %v296_v16, 6  ;;  %v3767_v19 = vcvt.f32.s32 %v3766_v10  ;;  %vm297_vm0 = vcmp.gt.s32.totalorder %v3831_v12, 0 }
  0x2f   :  { %vm199_vm15 = vcmp.lt.s32.totalorder %v136_v18, 23  ;;  %v360_v20 = vsel %vm359_vm14, %v296_v16, 6  ;;  %v62_v21 = vmul.f32 24.0, %v28_v13  ;;  %v571_v23 = vadd.s32 27, %v358_v15 }
  0x30   :  { %v200_v24 = vsel %vm199_vm15, %v136_v18, 23  ;;  %vm137_vm1 = vcmp.gt.s32.totalorder %v3767_v19, 0  ;;  %v298_v3 = vsel %vm297_vm0, %v3831_v12, 0  ;;  %v411_v25 = vadd.s32 3, %v198_v17 }
  0x31   :  { %461 = vperm.xlu1 %3880, %v410_v14   ;;  %v138_v26 = vsel %vm137_vm1, %v3767_v19, 0  ;;  %vm361_vm2 = vcmp.lt.s32.totalorder %v298_v3, 6  ;;  %v3768_v27 = vtrunc.f32 %v62_v21  ;;  %v572_v29 = vadd.s32 27, %v360_v20  ;;  %v4013_v19 = vld [vmem:[%s5008_s0 + $0x98] sm:$0xff] }
  0x32   :  { %621 = vperm.xlu0 %3879, %v570_v11   ;;  %vm201_vm3 = vcmp.lt.s32.totalorder %v138_v26, 23  ;;  %v3832_v30 = vtrunc.f32 %v28_v13  ;;  %v63_v31 = vmul.f32 24.0, %v29_v22  ;;  %v412_v33 = vadd.s32 3, %v200_v24 }
  0x33   :  { %v362_v34 = vsel %vm361_vm2, %v298_v3, 6  ;;  %v3769_v35 = vcvt.f32.s32 %v3768_v27  ;;  %v3834_v36 = vtrunc.f32 %v29_v22  ;;  %v202_v37 = vsel %vm201_vm3, %v138_v26, 23  ;;  %v4018_v3 = vld [vmem:[%s5008_s0 + $0xa0] sm:$0xff] }
  0x34   :  { %v3833_v38 = vcvt.f32.s32 %v3832_v30  ;;  %v3770_v39 = vtrunc.f32 %v63_v31  ;;  %v64_v40 = vmul.f32 24.0, %v30_v28  ;;  %v3836_v42 = vtrunc.f32 %v30_v28 }
  0x35   :  { %464 = vperm.xlu1 %3880, %v411_v25   ;;  %vm139_vm4 = vcmp.gt.s32.totalorder %v3769_v35, 0  ;;  %v3835_v41 = vcvt.f32.s32 %v3834_v36  ;;  %v65_v43 = vmul.f32 24.0, %v31_v32  ;;  %v413_v51 = vadd.s32 3, %v202_v37 }
  0x36   :  { %624 = vperm.xlu0 %3879, %v571_v23   ;;  %v140_v44 = vsel %vm139_vm4, %v3769_v35, 0  ;;  %vm299_vm5 = vcmp.gt.s32.totalorder %v3833_v38, 0  ;;  %v3771_v45 = vcvt.f32.s32 %v3770_v39  ;;  %v3772_v46 = vtrunc.f32 %v64_v40 }
  0x37   :  { %vm203_vm6 = vcmp.lt.s32.totalorder %v140_v44, 23  ;;  %v300_v47 = vsel %vm299_vm5, %v3833_v38, 0  ;;  %vm301_vm7 = vcmp.gt.s32.totalorder %v3835_v41, 0  ;;  %v3837_v48 = vcvt.f32.s32 %v3836_v42 }
  0x38   :  { %v204_v49 = vsel %vm203_vm6, %v140_v44, 23  ;;  %vm363_vm8 = vcmp.lt.s32.totalorder %v300_v47, 6  ;;  %vm141_vm9 = vcmp.gt.s32.totalorder %v3771_v45, 0  ;;  %v302_v50 = vsel %vm301_vm7, %v3835_v41, 0 }
  0x39   :  { %467 = vperm.xlu1 %3880, %v412_v33   ;;  %v364_v52 = vsel %vm363_vm8, %v300_v47, 6  ;;  %v142_v53 = vsel %vm141_vm9, %v3771_v45, 0  ;;  %v573_v54 = vadd.s32 27, %v362_v34  ;;  %v414_v55 = vadd.s32 3, %v204_v49 }
  0x3a   :  { %627 = vperm.xlu0 %3879, %v572_v29   ;;  %vm205_vm10 = vcmp.lt.s32.totalorder %v142_v53, 23  ;;  %v3773_v56 = vcvt.f32.s32 %v3772_v46  ;;  %v574_v58 = vadd.s32 27, %v364_v52  ;;  %vm365_vm11 = vcmp.lt.s32.totalorder %v302_v50, 6  ;;  %v4033_v52 = vld [vmem:[%s5008_s0 + $0xb0] sm:$0xff] }
  0x3b   :  { %vm303_vm12 = vcmp.gt.s32.totalorder %v3837_v48, 0  ;;  %v3774_v59 = vtrunc.f32 %v65_v43  ;;  %v206_v60 = vsel %vm205_vm10, %v142_v53, 23  ;;  %v3838_v62 = vtrunc.f32 %v31_v32  ;;  %v4027_v43 = vld [vmem:[%s5008_s0 + $0xa8] sm:$0xff] }
  0x3c   :  { %vm143_vm13 = vcmp.gt.s32.totalorder %v3773_v56, 0  ;;  %v304_v61 = vsel %vm303_vm12, %v3837_v48, 0  ;;  %v66_v1 = vmul.f32 24.0, %v32_v57  ;;  %v366_v2 = vsel %vm365_vm11, %v302_v50, 6 }
  0x3d   :  { %470 = vperm.xlu1 %3880, %v413_v51   ;;  %v144_v63 = vsel %vm143_vm13, %v3773_v56, 0  ;;  %vm367_vm14 = vcmp.lt.s32.totalorder %v304_v61, 6  ;;  %v3775_v0 = vcvt.f32.s32 %v3774_v59  ;;  %v3839_v4 = vcvt.f32.s32 %v3838_v62  ;;  %v4038_v59 = vld [vmem:[%s5008_s0 + $0xb8] sm:$0xff] }
  0x3e   :  { %630 = vperm.xlu0 %3879, %v573_v54   ;;  %vm207_vm15 = vcmp.lt.s32.totalorder %v144_v63, 23  ;;  %v3840_v5 = vtrunc.f32 %v32_v57  ;;  %v415_v7 = vadd.s32 3, %v206_v60  ;;  %v368_v8 = vsel %vm367_vm14, %v304_v61, 6 }
  0x3f   :  { %vm145_vm0 = vcmp.gt.s32.totalorder %v3775_v0, 0  ;;  %v3776_v9 = vtrunc.f32 %v66_v1  ;;  %v208_v10 = vsel %vm207_vm15, %v144_v63, 23  ;;  %vm305_vm1 = vcmp.gt.s32.totalorder %v3839_v4, 0  ;;  %v4045_v63 = vld [vmem:[%s5008_s0 + $0xc0] sm:$0xff] }
  0x40   :  { %v146_v11 = vsel %vm145_vm0, %v3775_v0, 0  ;;  %v3841_v12 = vcvt.f32.s32 %v3840_v5  ;;  %v306_v13 = vsel %vm305_vm1, %v3839_v4, 0  ;;  %v67_v15 = vmul.f32 24.0, %v33_v6 }
  0x41   :  { %473 = vperm.xlu1 %3880, %v414_v55   ;;  %vm209_vm2 = vcmp.lt.s32.totalorder %v146_v11, 23  ;;  %v3777_v14 = vcvt.f32.s32 %v3776_v9  ;;  %v575_v16 = vadd.s32 27, %v366_v2  ;;  %v3842_v18 = vtrunc.f32 %v33_v6 }
  0x42   :  { %633 = vperm.xlu0 %3879, %v574_v58   ;;  %v210_v17 = vsel %vm209_vm2, %v146_v11, 23  ;;  %vm307_vm3 = vcmp.gt.s32.totalorder %v3841_v12, 0  ;;  %v576_v20 = vadd.s32 27, %v368_v8  ;;  %vm369_vm4 = vcmp.lt.s32.totalorder %v306_v13, 6 }
  0x43   :  { %vm147_vm5 = vcmp.gt.s32.totalorder %v3777_v14, 0  ;;  %v308_v21 = vsel %vm307_vm3, %v3841_v12, 0  ;;  %v416_v22 = vadd.s32 3, %v208_v10  ;;  %v3778_v24 = vtrunc.f32 %v67_v15 }
  0x44   :  { %v148_v23 = vsel %vm147_vm5, %v3777_v14, 0  ;;  %vm371_vm6 = vcmp.lt.s32.totalorder %v308_v21, 6  ;;  %v417_v25 = vadd.s32 3, %v210_v17  ;;  %v3843_v26 = vcvt.f32.s32 %v3842_v18 }
  0x45   :  { %476 = vperm.xlu1 %3880, %v415_v7   ;;  %vm211_vm7 = vcmp.lt.s32.totalorder %v148_v23, 23  ;;  %v68_v27 = vmul.f32 24.0, %v4013_v19  ;;  %v370_v28 = vsel %vm369_vm4, %v306_v13, 6  ;;  %v372_v29 = vsel %vm371_vm6, %v308_v21, 6 }
  0x46   :  { %636 = vperm.xlu0 %3879, %v575_v16   ;;  %v3779_v30 = vcvt.f32.s32 %v3778_v24  ;;  %v3844_v31 = vtrunc.f32 %v4013_v19  ;;  %v212_v32 = vsel %vm211_vm7, %v148_v23, 23  ;;  %vm309_vm8 = vcmp.gt.s32.totalorder %v3843_v26, 0 }
  0x47   :  { %v3780_v33 = vtrunc.f32 %v68_v27  ;;  %v69_v34 = vmul.f32 24.0, %v4018_v3  ;;  %v310_v35 = vsel %vm309_vm8, %v3843_v26, 0  ;;  %v3846_v37 = vtrunc.f32 %v4018_v3 }
  0x48   :  { %vm149_vm9 = vcmp.gt.s32.totalorder %v3779_v30, 0  ;;  %v3845_v36 = vcvt.f32.s32 %v3844_v31  ;;  %vm373_vm10 = vcmp.lt.s32.totalorder %v310_v35, 6  ;;  %v577_v41 = vadd.s32 27, %v370_v28 }
  0x49   :  { %479 = vperm.xlu1 %3880, %v416_v22   ;;  %v150_v38 = vsel %vm149_vm9, %v3779_v30, 0  ;;  %v3781_v39 = vcvt.f32.s32 %v3780_v33  ;;  %v3782_v40 = vtrunc.f32 %v69_v34  ;;  %v3847_v42 = vcvt.f32.s32 %v3846_v37  ;;  %v4062_v37 = vld [vmem:[%s5008_s0 + $0xd0] sm:$0xff] }
  0x4a   :  { %639 = vperm.xlu0 %3879, %v576_v20   ;;  %vm213_vm11 = vcmp.lt.s32.totalorder %v150_v38, 23  ;;  %vm311_vm12 = vcmp.gt.s32.totalorder %v3845_v36, 0  ;;  %v578_v44 = vadd.s32 27, %v372_v29  ;;  %v374_v45 = vsel %vm373_vm10, %v310_v35, 6 }
  0x4b   :  { %vm151_vm13 = vcmp.gt.s32.totalorder %v3781_v39, 0  ;;  %v312_v46 = vsel %vm311_vm12, %v3845_v36, 0  ;;  %v418_v47 = vadd.s32 3, %v212_v32  ;;  %v214_v48 = vsel %vm213_vm11, %v150_v38, 23 }
  0x4c   :  { %v152_v49 = vsel %vm151_vm13, %v3781_v39, 0  ;;  %v3783_v50 = vcvt.f32.s32 %v3782_v40  ;;  %vm375_vm15 = vcmp.lt.s32.totalorder %v312_v46, 6  ;;  %vm313_vm0 = vcmp.gt.s32.totalorder %v3847_v42, 0 }
  0x4d   :  { %482 = vperm.xlu1 %3880, %v417_v25   ;;  %vm215_vm14 = vcmp.lt.s32.totalorder %v152_v49, 23  ;;  %v70_v51 = vmul.f32 24.0, %v4027_v43  ;;  %v579_v53 = vadd.s32 27, %v374_v45  ;;  %v314_v55 = vsel %vm313_vm0, %v3847_v42, 0  ;;  %v4054_v25 = vld [vmem:[%s5008_s0 + $0xc8] sm:$0xff] }
  0x4e   :  { %642 = vperm.xlu0 %3879, %v577_v41   ;;  %v216_v54 = vsel %vm215_vm14, %v152_v49, 23  ;;  %vm153_vm1 = vcmp.gt.s32.totalorder %v3783_v50, 0  ;;  %v419_v56 = vadd.s32 3, %v214_v48  ;;  %vm377_vm2 = vcmp.lt.s32.totalorder %v314_v55, 6 }
  0x4f   :  { %v154_v57 = vsel %vm153_vm1, %v3783_v50, 0  ;;  %v3784_v58 = vtrunc.f32 %v70_v51  ;;  %v376_v60 = vsel %vm375_vm15, %v312_v46, 6  ;;  %v3848_v61 = vtrunc.f32 %v4027_v43  ;;  %v4069_v50 = vld [vmem:[%s5008_s0 + $0xd8] sm:$0xff] }
  0x50   :  { %vm217_vm3 = vcmp.lt.s32.totalorder %v154_v57, 23  ;;  %v71_v62 = vmul.f32 24.0, %v4033_v52  ;;  %v420_v0 = vadd.s32 3, %v216_v54  ;;  %v378_v1 = vsel %vm377_vm2, %v314_v55, 6 }
  0x51   :  { %485 = vperm.xlu1 %3880, %v418_v47   ;;  %v3785_v2 = vcvt.f32.s32 %v3784_v58  ;;  %v3850_v4 = vtrunc.f32 %v4033_v52  ;;  %v218_v5 = vsel %vm217_vm3, %v154_v57, 23  ;;  %v3849_v6 = vcvt.f32.s32 %v3848_v61  ;;  %v4074_v58 = vld [vmem:[%s5008_s0 + $0xe0] sm:$0xff] }
  0x52   :  { %645 = vperm.xlu0 %3879, %v578_v44   ;;  %v3786_v7 = vtrunc.f32 %v71_v62  ;;  %v72_v8 = vmul.f32 24.0, %v4038_v59  ;;  %v3852_v10 = vtrunc.f32 %v4038_v59  ;;  %v73_v11 = vmul.f32 24.0, %v4045_v63 }
  0x53   :  { %vm155_vm4 = vcmp.gt.s32.totalorder %v3785_v2, 0  ;;  %v3851_v9 = vcvt.f32.s32 %v3850_v4  ;;  %vm315_vm5 = vcmp.gt.s32.totalorder %v3849_v6, 0  ;;  %v580_v17 = vadd.s32 27, %v376_v60 }
  0x54   :  { %v156_v12 = vsel %vm155_vm4, %v3785_v2, 0  ;;  %v3787_v13 = vcvt.f32.s32 %v3786_v7  ;;  %v3788_v14 = vtrunc.f32 %v72_v8  ;;  %v316_v15 = vsel %vm315_vm5, %v3849_v6, 0 }
  0x55   :  { %488 = vperm.xlu1 %3880, %v419_v56   ;;  %vm219_vm6 = vcmp.lt.s32.totalorder %v156_v12, 23  ;;  %vm317_vm7 = vcmp.gt.s32.totalorder %v3851_v9, 0  ;;  %v3853_v16 = vcvt.f32.s32 %v3852_v10  ;;  %vm379_vm8 = vcmp.lt.s32.totalorder %v316_v15, 6 }
  0x56   :  { %648 = vperm.xlu0 %3879, %v579_v53   ;;  %v220_v18 = vsel %vm219_vm6, %v156_v12, 23  ;;  %vm157_vm9 = vcmp.gt.s32.totalorder %v3787_v13, 0  ;;  %v318_v20 = vsel %vm317_vm7, %v3851_v9, 0  ;;  %v421_v21 = vadd.s32 3, %v218_v5 }
  0x57   :  { %v581_v22 = vadd.s32 27, %v378_v1  ;;  %v158_v23 = vsel %vm157_vm9, %v3787_v13, 0  ;;  %v3789_v24 = vcvt.f32.s32 %v3788_v14  ;;  %v422_v26 = vadd.s32 3, %v220_v18  ;;  %v4084_v14 = vld [vmem:[%s5008_s0 + $0xe8] sm:$0xff] }
  0x58   :  { %v380_v27 = vsel %vm379_vm8, %v316_v15, 6  ;;  %vm319_vm10 = vcmp.gt.s32.totalorder %v3853_v16, 0  ;;  %v3790_v28 = vtrunc.f32 %v73_v11  ;;  %vm381_vm11 = vcmp.lt.s32.totalorder %v318_v20, 6 }
  0x59   :  { %491 = vperm.xlu1 %3880, %v420_v0   ;;  %vm159_vm12 = vcmp.gt.s32.totalorder %v3789_v24, 0  ;;  %v320_v29 = vsel %vm319_vm10, %v3853_v16, 0  ;;  %v3854_v30 = vtrunc.f32 %v4045_v63  ;;  %vm221_vm13 = vcmp.lt.s32.totalorder %v158_v23, 23 }
  0x5a   :  { %651 = vperm.xlu0 %3879, %v580_v17   ;;  %v160_v31 = vsel %vm159_vm12, %v3789_v24, 0  ;;  %v3791_v32 = vcvt.f32.s32 %v3790_v28  ;;  %v74_v33 = vmul.f32 24.0, %v4054_v25  ;;  %v582_v34 = vadd.s32 27, %v380_v27  ;;  %v4092_v24 = vld [vmem:[%s5008_s0 + $0xf0] sm:$0xff] }
  0x5b   :  { %vm383_vm14 = vcmp.lt.s32.totalorder %v320_v29, 6  ;;  %v3855_v35 = vcvt.f32.s32 %v3854_v30  ;;  %v3856_v36 = vtrunc.f32 %v4054_v25  ;;  %v382_v38 = vsel %vm381_vm11, %v318_v20, 6 }
  0x5c   :  { %vm223_vm15 = vcmp.lt.s32.totalorder %v160_v31, 23  ;;  %vm161_vm0 = vcmp.gt.s32.totalorder %v3791_v32, 0  ;;  %v3792_v39 = vtrunc.f32 %v74_v33  ;;  %v222_v40 = vsel %vm221_vm13, %v158_v23, 23 }
  0x5d   :  { %494 = vperm.xlu1 %3880, %v421_v21   ;;  %v162_v41 = vsel %vm161_vm0, %v3791_v32, 0  ;;  %vm321_vm1 = vcmp.gt.s32.totalorder %v3855_v35, 0  ;;  %v3857_v42 = vcvt.f32.s32 %v3856_v36  ;;  %v384_v44 = vsel %vm383_vm14, %v320_v29, 6  ;;  %v4097_v32 = vld [vmem:[%s5008_s0 + $0xf8] sm:$0xff] }
  0x5e   :  { %654 = vperm.xlu0 %3879, %v581_v22   ;;  %v322_v45 = vsel %vm321_vm1, %v3855_v35, 0  ;;  %v3793_v46 = vcvt.f32.s32 %v3792_v39  ;;  %v75_v47 = vmul.f32 24.0, %v4062_v37  ;;  %v224_v48 = vsel %vm223_vm15, %v160_v31, 23 }
  0x5f   :  { %vm225_vm2 = vcmp.lt.s32.totalorder %v162_v41, 23  ;;  %vm323_vm3 = vcmp.gt.s32.totalorder %v3857_v42, 0  ;;  %v3858_v49 = vtrunc.f32 %v4062_v37  ;;  %v423_v51 = vadd.s32 3, %v222_v40 }
  0x60   :  { %vm385_vm4 = vcmp.lt.s32.totalorder %v322_v45, 6  ;;  %vm163_vm5 = vcmp.gt.s32.totalorder %v3793_v46, 0  ;;  %v324_v53 = vsel %vm323_vm3, %v3857_v42, 0  ;;  %v583_v54 = vadd.s32 27, %v382_v38 }
  0x61   :  { %497 = vperm.xlu1 %3880, %v422_v26   ;;  %v584_v55 = vadd.s32 27, %v384_v44  ;;  %v164_v56 = vsel %vm163_vm5, %v3793_v46, 0  ;;  %v3794_v57 = vtrunc.f32 %v75_v47  ;;  %v424_v60 = vadd.s32 3, %v224_v48 }
  0x62   :  { %657 = vperm.xlu0 %3879, %v582_v34   ;;  %v226_v61 = vsel %vm225_vm2, %v162_v41, 23  ;;  %v3859_v62 = vcvt.f32.s32 %v3858_v49  ;;  %v76_v0 = vmul.f32 24.0, %v4069_v50  ;;  %v386_v1 = vsel %vm385_vm4, %v322_v45, 6 }
  0x63   :  { %vm387_vm6 = vcmp.lt.s32.totalorder %v324_v53, 6  ;;  %v3795_v2 = vcvt.f32.s32 %v3794_v57  ;;  %v3860_v4 = vtrunc.f32 %v4069_v50  ;;  %vm227_vm7 = vcmp.lt.s32.totalorder %v164_v56, 23 }
  0x64   :  { %vm325_vm8 = vcmp.gt.s32.totalorder %v3859_v62, 0  ;;  %v3796_v5 = vtrunc.f32 %v76_v0  ;;  %v77_v6 = vmul.f32 24.0, %v4074_v58  ;;  %v3862_v9 = vtrunc.f32 %v4074_v58 }
  0x65   :  { %500 = vperm.xlu1 %3880, %v423_v51   ;;  %vm165_vm9 = vcmp.gt.s32.totalorder %v3795_v2, 0  ;;  %v326_v7 = vsel %vm325_vm8, %v3859_v62, 0  ;;  %v3861_v8 = vcvt.f32.s32 %v3860_v4  ;;  %v425_v13 = vadd.s32 3, %v226_v61 }
  0x66   :  { %660 = vperm.xlu0 %3879, %v583_v54   ;;  %v166_v10 = vsel %vm165_vm9, %v3795_v2, 0  ;;  %vm389_vm10 = vcmp.lt.s32.totalorder %v326_v7, 6  ;;  %v3797_v11 = vcvt.f32.s32 %v3796_v5  ;;  %v3798_v12 = vtrunc.f32 %v77_v6  ;;  %v883_v5 = vld [vmem:[%s5009_s1] sm:$0xff]  ;;  %v884_v6 = vld [vmem:[%s5009_s1 + $0x8] sm:$0xff] }
  0x67   :  { %vm229_vm11 = vcmp.lt.s32.totalorder %v166_v10, 23  ;;  %v585_v15 = vadd.s32 27, %v386_v1  ;;  %v388_v16 = vsel %vm387_vm6, %v324_v53, 6  ;;  %vm327_vm13 = vcmp.gt.s32.totalorder %v3861_v8, 0 }
  0x68   :  { %vm167_vm12 = vcmp.gt.s32.totalorder %v3797_v11, 0  ;;  %v228_v17 = vsel %vm227_vm7, %v164_v56, 23  ;;  %v390_v18 = vsel %vm389_vm10, %v326_v7, 6  ;;  %v3799_v20 = vcvt.f32.s32 %v3798_v12 }
  0x69   :  { %503 = vperm.xlu1 %3880, %v424_v60   ;;  %v3863_v21 = vcvt.f32.s32 %v3862_v9  ;;  %v230_v22 = vsel %vm229_vm11, %v166_v10, 23  ;;  %v78_v23 = vmul.f32 24.0, %v4084_v14  ;;  %v586_v26 = vadd.s32 27, %v388_v16  ;;  %v4114_v9 = vld [vmem:[%s5009_s1 + $0x10] sm:$0xff]  ;;  %v4119_v10 = vld [vmem:[%s5009_s1 + $0x18] sm:$0xff] }
  0x6a   :  { %663 = vperm.xlu0 %3879, %v584_v55   ;;  %v168_v27 = vsel %vm167_vm12, %v3797_v11, 0  ;;  %v328_v28 = vsel %vm327_vm13, %v3861_v8, 0  ;;  %v426_v29 = vadd.s32 3, %v228_v17  ;;  %v587_v30 = vadd.s32 27, %v390_v18  ;;  %v887_v17 = vld [vmem:[%s5009_s1 + $0x20] sm:$0x3] }
  0x6b   :  { %vm169_vm14 = vcmp.gt.s32.totalorder %v3799_v20, 0  ;;  %v3800_v31 = vtrunc.f32 %v78_v23  ;;  %v427_v33 = vadd.s32 3, %v230_v22  ;;  %vm329_vm15 = vcmp.gt.s32.totalorder %v3863_v21, 0 }
  0x6c   :  { %v3864_v34 = vtrunc.f32 %v4084_v14  ;;  %v79_v35 = vmul.f32 24.0, %v4092_v24  ;;  %vm231_vm0 = vcmp.lt.s32.totalorder %v168_v27, 23  ;;  %vm391_vm1 = vcmp.lt.s32.totalorder %v328_v28, 6 }
  0x6d   :  { %506 = vperm.xlu1 %3880, %v425_v13   ;;  %v3801_v36 = vcvt.f32.s32 %v3800_v31  ;;  %v3866_v38 = vtrunc.f32 %v4092_v24  ;;  %v170_v39 = vsel %vm169_vm14, %v3799_v20, 0  ;;  %v80_v42 = vmul.f32 24.0, %v4097_v32 }
  0x6e   :  { %666 = vperm.xlu0 %3879, %v585_v15   ;;  %v3865_v40 = vcvt.f32.s32 %v3864_v34  ;;  %v3802_v41 = vtrunc.f32 %v79_v35  ;;  %v330_v44 = vsel %vm329_vm15, %v3863_v21, 0  ;;  %v3868_v46 = vtrunc.f32 %v4097_v32 }
  0x6f   :  { %vm171_vm2 = vcmp.gt.s32.totalorder %v3801_v36, 0  ;;  %v3867_v45 = vcvt.f32.s32 %v3866_v38  ;;  %v232_v47 = vsel %vm231_vm0, %v168_v27, 23  ;;  %v3804_v49 = vtrunc.f32 %v80_v42 }
  0x70   :  { %vm331_vm3 = vcmp.gt.s32.totalorder %v3865_v40, 0  ;;  %v3803_v48 = vcvt.f32.s32 %v3802_v41  ;;  %v392_v51 = vsel %vm391_vm1, %v328_v28, 6  ;;  %vm233_vm4 = vcmp.lt.s32.totalorder %v170_v39, 23 }
  0x71   :  { %509 = vperm.xlu1 %3880, %v426_v29   ;;  %v172_v53 = vsel %vm171_vm2, %v3801_v36, 0  ;;  %vm393_vm5 = vcmp.lt.s32.totalorder %v330_v44, 6  ;;  %v332_v54 = vsel %vm331_vm3, %v3865_v40, 0  ;;  %v3869_v55 = vcvt.f32.s32 %v3868_v46 }
  0x72   :  { %669 = vperm.xlu0 %3879, %v586_v26   ;;  %v428_v56 = vadd.s32 3, %v232_v47  ;;  %vm173_vm6 = vcmp.gt.s32.totalorder %v3803_v48, 0  ;;  %vm333_vm7 = vcmp.gt.s32.totalorder %v3867_v45, 0  ;;  %v588_v57 = vadd.s32 27, %v392_v51 }
  0x73   :  { %v234_v60 = vsel %vm233_vm4, %v170_v39, 23  ;;  %vm235_vm8 = vcmp.lt.s32.totalorder %v172_v53, 23  ;;  %v3805_v61 = vcvt.f32.s32 %v3804_v49  ;;  %v394_v62 = vsel %vm393_vm5, %v330_v44, 6 }
  0x74   :  { %vm395_vm9 = vcmp.lt.s32.totalorder %v332_v54, 6  ;;  %v174_v0 = vsel %vm173_vm6, %v3803_v48, 0  ;;  %v334_v1 = vsel %vm333_vm7, %v3867_v45, 0  ;;  %vm335_vm10 = vcmp.gt.s32.totalorder %v3869_v55, 0 }
  0x75   :  { %512 = vperm.xlu1 %3880, %v427_v33   ;;  %v429_v2 = vadd.s32 3, %v234_v60  ;;  %v236_v4 = vsel %vm235_vm8, %v172_v53, 23  ;;  %vm175_vm11 = vcmp.gt.s32.totalorder %v3805_v61, 0  ;;  %v589_v7 = vadd.s32 27, %v394_v62 }
  0x76   :  { %672 = vperm.xlu0 %3879, %v587_v30   ;;  %v396_v8 = vsel %vm395_vm9, %v332_v54, 6  ;;  %vm237_vm12 = vcmp.lt.s32.totalorder %v174_v0, 23  ;;  %vm397_vm13 = vcmp.lt.s32.totalorder %v334_v1, 6  ;;  %v336_v11 = vsel %vm335_vm10, %v3869_v55, 0 }
  0x77   :  { %v430_v12 = vadd.s32 3, %v236_v4  ;;  %v176_v13 = vsel %vm175_vm11, %v3805_v61, 0  ;;  %v1022_v15 = vand.u32 4294901760, %v883_v5  ;;  %v1025_v16 = vand.u32 4294901760, %v884_v6  ;;  %v3882_v4 = vld [vmem:[%s5008_s0 + $0x10] sm:$0xff] }
  0x78   :  { %v590_v18 = vadd.s32 27, %v396_v8  ;;  %v1028_v20 = vand.u32 4294901760, %v4114_v9  ;;  %v1031_v21 = vand.u32 4294901760, %v4119_v10  ;;  %vm1017_vm14 = vcmask 1041408  }
  0x79   :  { %515 = vperm.xlu1 %3880, %v428_v56   ;;  %v238_v22 = vsel %vm237_vm12, %v174_v0, 23  ;;  %v398_v23 = vsel %vm397_vm13, %v334_v1, 6  ;;  %vm399_vm15 = vcmp.lt.s32.totalorder %v336_v11, 6  ;;  %v4126_v26 = vpack.c.bf16 %v1025_v16, %v1022_v15 }
  0x7a   :  { %675 = vperm.xlu0 %3879, %v588_v57   ;;  %vm239_vm0 = vcmp.lt.s32.totalorder %v176_v13, 23  ;;  %v4132_v27 = vpack.c.bf16 %v1031_v21, %v1028_v20  ;;  %v4134_v28 = vsel %vm1017_vm14, %v887_v17, 0  ;;  %v431_v29 = vadd.s32 3, %v238_v22 }
  0x7b   :  { %3527 = vmatprep.subr.bf16.mxu0 %v4126_v26  ;;  %3503 = vmatprep.subr.bf16.mxu1 %v4126_v26  ;;  %v591_v30 = vadd.s32 27, %v398_v23  ;;  %v400_v31 = vsel %vm399_vm15, %v336_v11, 6  ;;  %vm817_vm1 = vcmask 39936   ;;  %v240_v33 = vsel %vm239_vm0, %v176_v13, 23 }
  0x7c   :  { %3529 = vmatpush3.bf16.msra.mxu0 %v4126_v26  ;;  %v4141_v34 = vand.u32 4294901760, %v4134_v28  ;;  %v4145_v35 = vsel %vm817_vm1, %v4013_v19, 0.0  ;;  %v4147_v36 = vsub.f32 %v883_v5, %v1022_v15  ;;  %3505 = vmatpush3.bf16.msra.mxu1 %v4126_v26  ;;  %v4150_v38 = vsub.f32 %v884_v6, %v1025_v16 }
  0x7d   :  { %518 = vperm.xlu1 %3880, %v429_v2   ;;  %3531 = vmatprep.subr.bf16.mxu0 %v4132_v27  ;;  %v4154_v39 = vsel %vm817_vm1, %v4018_v3, 0.0  ;;  %v4158_v40 = vsel %vm817_vm1, %v4027_v43, 0.0  ;;  %v4162_v41 = vsel %vm817_vm1, %v4033_v52, 0.0  ;;  %v4168_v42 = vsel %vm817_vm1, %v4038_v59, 0.0 }
  0x7e   :  { %678 = vperm.xlu0 %3879, %v589_v7   ;;  %3507 = vmatprep.subr.bf16.mxu1 %v4132_v27  ;;  %v1414_v19 = vand.u32 4294901760, %v4147_v36  ;;  %v4172_v3 = vsel %vm817_vm1, %v4045_v63, 0.0  ;;  %v4176_v43 = vsel %vm817_vm1, %v4054_v25, 0.0  ;;  %v432_v44 = vadd.s32 3, %v240_v33 }
  0x7f   :  { %v592_v52 = vadd.s32 27, %v400_v31  ;;  %v1421_v45 = vand.u32 4294901760, %v4150_v38  ;;  %v4182_v46 = vsel %vm817_vm1, %v4062_v37, 0.0  ;;  %v4188_v63 = vsel %vm817_vm1, %v4069_v50, 0.0  ;;  %v3884_v31 = vld [vmem:[%s5008_s0 + $0x18] sm:$0xff] }
  0x80   :  { %3533 = vmatpush3.bf16.msra.mxu0 %v4132_v27  ;;  %v1415_v59 = vsub.f32 %v4147_v36, %v1414_v19  ;;  %v4192_v25 = vsel %vm817_vm1, %v4074_v58, 0.0  ;;  %v4196_v47 = vsel %vm817_vm1, %v4084_v14, 0.0  ;;  %3509 = vmatpush3.bf16.msra.mxu1 %v4132_v27  ;;  %v47_v50 = vlaneseq }
  0x81   :  { %521 = vperm.xlu1 %3880, %v430_v12   ;;  %3336 = vmatprep.subr.mxu0 %v4141_v34  ;;  %v1422_v37 = vsub.f32 %v4150_v38, %v1421_v45  ;;  %v4200_v48 = vpack.c.bf16 %v1421_v45, %v1414_v19  ;;  %v4207_v58 = vsel %vm817_vm1, %v4092_v24, 0.0  ;;  %v4217_v56 = vsel %vm817_vm1, %v4097_v32, 0.0  ;;  %v3881_v24 = vld [vmem:[%s5008_s0 + $0x8] sm:$0xff] }
  0x82   :  { %681 = vperm.xlu0 %3879, %v590_v18   ;;  %3162 = vmatprep.subr.mxu1 %v4141_v34  ;;  %v1416_v49 = vand.u32 4294901760, %v1415_v59  ;;  %v4212_v55 = vand.u32 127, %v47_v50  ;;  %v819_v61 = vsel %vm817_vm1, %v3881_v24, 0.0  ;;  %vm920_vm5 = vcmask 277504  }
  0x83   :  { %v1423_v51 = vand.u32 4294901760, %v1422_v37  ;;  %v5012_v62 = vmov 0.0   ;;  %v4230_v0 = vsub.f32 %v4114_v9, %v1028_v20  ;;  %v4235_v1 = vsub.f32 %v4119_v10, %v1031_v21  ;;  %v3883_v10 = vld [vmem:[%s5008_s0] sm:$0xff] }
  0x84   :  { %3337 = vmatpush3.msra.mxu0 %v4141_v34  ;;  %3163 = vmatpush3.msra.mxu1 %v4141_v34  ;;  %vm850_vm3 = vcmp.lt.s32.totalorder %v4212_v55, 3  ;;  %v820_v5 = vsel %vm817_vm1, %v3882_v4, 0.0  ;;  %v818_v11 = vsel %vm817_vm1, %v3883_v10, 0.0  ;;  %v821_v33 = vsel %vm817_vm1, %v3884_v31, 0.0 }
  0x85   :  { %524 = vperm.xlu1 %3880, %v431_v29   ;;  %3535 = vmatprep.subr.bf16.mxu0 %v4200_v48  ;;  %v4210_v54 = vpack.c.bf16 %v1423_v51, %v1416_v49  ;;  %v1428_v13 = vand.u32 4294901760, %v4230_v0  ;;  %v1435_v15 = vand.u32 4294901760, %v4235_v1  ;;  %v4286_v50 = vsub.f32 %v4134_v28, %v4141_v34 }
  0x86   :  { %684 = vperm.xlu0 %3879, %v591_v30  }
  0x87   :  { %3511 = vmatprep.subr.bf16.mxu1 %v4210_v54 }
  0x89   :  { %527 = vperm.xlu1 %3880, %v432_v44   ;;  %v1429_v44 = vsub.f32 %v4230_v0, %v1428_v13 }
  0x8a   :  { %687 = vperm.xlu0 %3879, %v592_v52   ;;  %v1436_v52 = vsub.f32 %v4235_v1, %v1435_v15 }
  0x8b   :  { %v595_v14 = vpop.permute.xlu0 %594  ;;  %v598_v53 = vpop.permute.xlu1 %597  ;;  %v1430_v4 = vand.u32 4294901760, %v1429_v44 }
  0x8c   :  { %vm690_vm2 = vcmp.eq.s32.totalorder %v4212_v55, %v598_v53  ;;  %vm689_vm10 = vcmp.eq.s32.totalorder %v4212_v55, %v595_v14  ;;  %v3885_v14 = vld [vmem:[%s5008_s0 + $0x20] sm:$0xff] }
  0x8d   :  { %v822_v53 = vsel %vm817_vm1, %v3885_v14, 0.0 }
  0x8f   :  { %v601_v57 = vpop.permute.xlu0 %600 }
  0x90   :  { %v438_v60 = vpop.permute.xlu1 %437  ;;  %vm691_vm7 = vcmp.eq.s32.totalorder %v4212_v55, %v601_v57 }
  0x91   :  { %vm530_vm4 = vcmp.eq.s32.totalorder %v4212_v55, %v438_v60 }
  0x92   :  { %vm722_vm6 = vmor %vm530_vm4, %vm690_vm2 }
  0x93   :  { %v2901_v32 = vsel %vm722_vm6, 1.0, %v5012_v62 }
  0x94   :  { %v852_v2 = vsel %vm850_vm3, %v819_v61, %v2901_v32  ;;  %v441_v6 = vpop.permute.xlu1 %440  ;;  %v435_v7 = vpop.permute.xlu0 %434  ;;  %v3538_v61 = vpack.c.bf16 %v1435_v15, %v1428_v13 }
  0x95   :  { %v925_v8 = vsel %vm920_vm5, %v852_v2, 0  ;;  %vm531_vm8 = vcmp.eq.s32.totalorder %v4212_v55, %v441_v6  ;;  %vm529_vm9 = vcmp.eq.s32.totalorder %v4212_v55, %v435_v7 }
  0x96   :  { %v4248_v9 = vand.u32 4294901760, %v925_v8  ;;  %vm723_vm11 = vmor %vm531_vm8, %vm691_vm7 }
  0x97   :  { %v2902_v12 = vsel %vm723_vm11, 1.0, %v5012_v62  ;;  %vm721_vm12 = vmor %vm529_vm9, %vm689_vm10 }
  0x98   :  { %v4258_v16 = vsub.f32 %v925_v8, %v4248_v9  ;;  %v853_v17 = vsel %vm850_vm3, %v820_v5, %v2902_v12  ;;  %v2900_v18 = vsel %vm721_vm12, 1.0, %v5012_v62  ;;  %v444_v20 = vpop.permute.xlu1 %443  ;;  %v1437_v5 = vand.u32 4294901760, %v1436_v52 }
  0x99   :  { %v928_v21 = vsel %vm920_vm5, %v853_v17, 0  ;;  %v851_v22 = vsel %vm850_vm3, %v818_v11, %v2900_v18  ;;  %vm532_vm13 = vcmp.eq.s32.totalorder %v4212_v55, %v444_v20  ;;  %v604_v23 = vpop.permute.xlu0 %603  ;;  %v4308_v11 = vand.u32 4294901760, %v4286_v50  ;;  %v3886_v20 = vld [vmem:[%s5008_s0 + $0x28] sm:$0xff] }
  0x9a   :  { %v4267_v29 = vand.u32 4294901760, %v928_v21  ;;  %v922_v30 = vsel %vm920_vm5, %v851_v22, 0  ;;  %vm692_vm14 = vcmp.eq.s32.totalorder %v4212_v55, %v604_v23  ;;  %v1103_v49 = vand.u32 4294901760, %v4258_v16 }
  0x9b   :  { %v4275_v19 = vand.u32 4294901760, %v922_v30  ;;  %vm724_vm15 = vmor %vm532_vm13, %vm692_vm14  ;;  %v3514_v31 = vpack.c.bf16 %v1437_v5, %v1430_v4 }
  0x9c   :  { %v4280_v45 = vsub.f32 %v928_v21, %v4267_v29  ;;  %v2903_v59 = vsel %vm724_vm15, 1.0, %v5012_v62  ;;  %v447_v37 = vpop.permute.xlu1 %446  ;;  %v1104_v8 = vsub.f32 %v4258_v16, %v1103_v49  ;;  %v823_v21 = vsel %vm817_vm1, %v3886_v20, 0.0 }
  0x9d   :  { %v854_v51 = vsel %vm850_vm3, %v821_v33, %v2903_v59  ;;  %vm533_vm0 = vcmp.eq.s32.totalorder %v4212_v55, %v447_v37  ;;  %v607_v57 = vpop.permute.xlu0 %606  ;;  %v4296_v60 = vsub.f32 %v922_v30, %v4275_v19  ;;  %v1443_v37 = vsub.f32 %v4286_v50, %v4308_v11 }
  0x9e   :  { %v931_v24 = vsel %vm920_vm5, %v854_v51, 0  ;;  %vm693_vm2 = vcmp.eq.s32.totalorder %v4212_v55, %v607_v57  ;;  %v1113_v28 = vand.u32 4294901760, %v4280_v45  ;;  %v1105_v52 = vand.u32 4294901760, %v1104_v8  ;;  %v3887_v57 = vld [vmem:[%s5008_s0 + $0x30] sm:$0xff] }
  0x9f   :  { %v4301_v32 = vand.u32 4294901760, %v931_v24  ;;  %vm725_vm4 = vmor %vm533_vm0, %vm693_vm2  ;;  %v1093_v2 = vand.u32 4294901760, %v4296_v60 }
  0xa0   :  { %v2904_v6 = vsel %vm725_vm4, 1.0, %v5012_v62  ;;  %v450_v7 = vpop.permute.xlu1 %449  ;;  %v1114_v10 = vsub.f32 %v4280_v45, %v1113_v28 }
  0xa1   :  { %v4311_v12 = vsub.f32 %v931_v24, %v4301_v32  ;;  %v855_v13 = vsel %vm850_vm3, %v822_v53, %v2904_v6  ;;  %vm534_vm6 = vcmp.eq.s32.totalorder %v4212_v55, %v450_v7  ;;  %3338 = vmatprep.mubr.f32.mxu0 %v1093_v2  ;;  %v610_v15 = vpop.permute.xlu0 %609  ;;  %v1094_v17 = vsub.f32 %v4296_v60, %v1093_v2 }
  0xa2   :  { %v934_v18 = vsel %vm920_vm5, %v855_v13, 0  ;;  %3339 = vmatmul.mubr.f32.vlgmr.msra.gmra.mrb[0].mxu0 %v1103_v49  ;;  %vm694_vm7 = vcmp.eq.s32.totalorder %v4212_v55, %v610_v15  ;;  %v1115_v59 = vand.u32 4294901760, %v1114_v10  ;;  %v824_v24 = vsel %vm817_vm1, %v3887_v57, 0.0 }
  0xa3   :  { %v4323_v22 = vand.u32 4294901760, %v934_v18  ;;  %vm726_vm8 = vmor %vm534_vm6, %vm694_vm7  ;;  %3341 = vmatprep.mubr.f32.mxu0 %v1113_v28  ;;  %v1095_v23 = vand.u32 4294901760, %v1094_v17  ;;  %v1123_v30 = vand.u32 4294901760, %v4311_v12  ;;  %3537 = vmatpush3.bf16.msra.mxu0 %v4200_v48  ;;  %v1444_v7 = vand.u32 4294901760, %v1443_v37 }
  0xa4   :  { %v2905_v33 = vsel %vm726_vm8, 1.0, %v5012_v62  ;;  %v453_v44 = vpop.permute.xlu1 %452  ;;  %3539 = vmatprep.subr.bf16.mxu0 %v3538_v61 }
  0xa5   :  { %v4331_v49 = vsub.f32 %v934_v18, %v4323_v22  ;;  %v856_v51 = vsel %vm850_vm3, %v823_v21, %v2905_v33  ;;  %vm535_vm9 = vcmp.eq.s32.totalorder %v4212_v55, %v453_v44  ;;  %3164 = vmatprep.mubr.f32.mxu1 %v1095_v23  ;;  %v613_v48 = vpop.permute.xlu0 %612  ;;  %v1124_v14 = vsub.f32 %v4311_v12, %v1123_v30 }
  0xa6   :  { %v937_v53 = vsel %vm920_vm5, %v856_v51, 0  ;;  %3165 = vmatmul.mubr.f32.vlgmr.msra.gmra.mrb[0].mxu1 %v1105_v52  ;;  %3342 = vmatmul.mubr.f32.gmra.mrb[2].mxu0 %v1123_v30  ;;  %vm695_vm10 = vcmp.eq.s32.totalorder %v4212_v55, %v613_v48  ;;  %v4369_v33 = vpack.c.bf16 %v4150_v38, %v4147_v36 }
  0xa7   :  { %v4343_v28 = vand.u32 4294901760, %v937_v53  ;;  %vm727_vm11 = vmor %vm535_vm9, %vm695_vm10  ;;  %3167 = vmatprep.mubr.f32.mxu1 %v1115_v59  ;;  %v1125_v2 = vand.u32 4294901760, %v1124_v14  ;;  %v1133_v4 = vand.u32 4294901760, %v4331_v49  ;;  %3513 = vmatpush3.bf16.msra.mxu1 %v4210_v54 }
  0xa8   :  { %v2906_v5 = vsel %vm727_vm11, 1.0, %v5012_v62  ;;  %v456_v6 = vpop.permute.xlu1 %455  ;;  %3515 = vmatprep.subr.bf16.mxu1 %v3514_v31  ;;  %3541 = vmatpush3.bf16.msra.mxu0 %v3538_v61  ;;  %v3888_v61 = vld [vmem:[%s5008_s0 + $0x38] sm:$0xff] }
  0xa9   :  { %v4349_v8 = vsub.f32 %v937_v53, %v4343_v28  ;;  %v857_v10 = vsel %vm850_vm3, %v824_v24, %v2906_v5  ;;  %vm536_vm12 = vcmp.eq.s32.totalorder %v4212_v55, %v456_v6  ;;  %3344 = vmatprep.mubr.f32.mxu0 %v1133_v4  ;;  %v616_v13 = vpop.permute.xlu0 %615  ;;  %v1134_v15 = vsub.f32 %v4331_v49, %v1133_v4  ;;  %v3890_v6 = vld [vmem:[%s5008_s0 + $0x48] sm:$0xff] }
  0xaa   :  { %v940_v54 = vsel %vm920_vm5, %v857_v10, 0  ;;  %3168 = vmatmul.mubr.f32.gmra.mrb[2].mxu1 %v1125_v2  ;;  %v825_v17 = vsel %vm817_vm1, %v3888_v61, 0.0  ;;  %vm696_vm13 = vcmp.eq.s32.totalorder %v4212_v55, %v616_v13  ;;  %3394 = vmatprep.subr.mxu0 %v4308_v11  ;;  %v4405_v10 = vpack.c.bf16 %v4235_v1, %v4230_v0 }
  0xab   :  { %v4362_v18 = vand.u32 4294901760, %v940_v54  ;;  %vm728_vm14 = vmor %vm536_vm12, %vm696_vm13  ;;  %v1135_v20 = vand.u32 4294901760, %v1134_v15  ;;  %v1143_v21 = vand.u32 4294901760, %v4349_v8  ;;  %3517 = vmatpush3.bf16.msra.mxu1 %v3514_v31 }
  0xac   :  { %v2907_v23 = vsel %vm728_vm14, 1.0, %v5012_v62  ;;  %v459_v30 = vpop.permute.xlu1 %458  ;;  %3220 = vmatprep.subr.mxu1 %v1444_v7  ;;  %3395 = vmatpush3.msra.mxu0 %v4308_v11  ;;  %v3889_v11 = vld [vmem:[%s5008_s0 + $0x40] sm:$0xff] }
  0xad   :  { %v4372_v44 = vsub.f32 %v940_v54, %v4362_v18  ;;  %v858_v52 = vsel %vm850_vm3, %v825_v17, %v2907_v23  ;;  %vm537_vm15 = vcmp.eq.s32.totalorder %v4212_v55, %v459_v30  ;;  %3170 = vmatprep.mubr.f32.mxu1 %v1135_v20  ;;  %3345 = vmatmul.mubr.f32.gmra.mrb[4].mxu0 %v1143_v21  ;;  %v619_v31 = vpop.permute.xlu0 %618  ;;  %v826_v36 = vsel %vm817_vm1, %v3889_v11, 0.0  ;;  %v3891_v23 = vld [vmem:[%s5008_s0 + $0x50] sm:$0xff] }
  0xae   :  { %v943_v59 = vsel %vm920_vm5, %v858_v52, 0  ;;  %vm697_vm0 = vcmp.eq.s32.totalorder %v4212_v55, %v619_v31  ;;  %v1144_v38 = vsub.f32 %v4349_v8, %v1143_v21  ;;  %3543 = vmatprep.subr.bf16.mxu0 %v4126_v26  ;;  %v828_v30 = vsel %vm817_vm1, %v3891_v23, 0.0 }
  0xaf   :  { %v4385_v37 = vand.u32 4294901760, %v943_v59  ;;  %vm729_vm2 = vmor %vm537_vm15, %vm697_vm0  ;;  %v1153_v51 = vand.u32 4294901760, %v4372_v44  ;;  %3221 = vmatpush3.msra.mxu1 %v1444_v7  ;;  %v827_v7 = vsel %vm817_vm1, %v3890_v6, 0.0 }
  0xb0   :  { %v2908_v48 = vsel %vm729_vm2, 1.0, %v5012_v62  ;;  %v462_v14 = vpop.permute.xlu1 %461  ;;  %v1145_v53 = vand.u32 4294901760, %v1144_v38  ;;  %3519 = vmatprep.subr.bf16.mxu1 %v4369_v33 }
  0xb1   :  { %v4391_v57 = vsub.f32 %v943_v59, %v4385_v37  ;;  %v859_v24 = vsel %vm850_vm3, %v826_v36, %v2908_v48  ;;  %vm538_vm4 = vcmp.eq.s32.totalorder %v4212_v55, %v462_v14  ;;  %3347 = vmatprep.mubr.f32.mxu0 %v1153_v51  ;;  %v622_v2 = vpop.permute.xlu0 %621  ;;  %v1154_v4 = vsub.f32 %v4372_v44, %v1153_v51 }
  0xb2   :  { %v946_v5 = vsel %vm920_vm5, %v859_v24, 0  ;;  %3171 = vmatmul.mubr.f32.gmra.mrb[4].mxu1 %v1145_v53  ;;  %vm698_vm6 = vcmp.eq.s32.totalorder %v4212_v55, %v622_v2  ;;  %v3892_v2 = vld [vmem:[%s5008_s0 + $0x58] sm:$0xff] }
  0xb3   :  { %v4407_v13 = vand.u32 4294901760, %v946_v5  ;;  %vm730_vm7 = vmor %vm538_vm4, %vm698_vm6  ;;  %v1155_v15 = vand.u32 4294901760, %v1154_v4  ;;  %v1163_v54 = vand.u32 4294901760, %v4391_v57  ;;  %v829_v4 = vsel %vm817_vm1, %v3892_v2, 0.0 }
  0xb4   :  { %v2909_v61 = vsel %vm730_vm7, 1.0, %v5012_v62  ;;  %v465_v17 = vpop.permute.xlu1 %464 }
  0xb5   :  { %v4412_v20 = vsub.f32 %v946_v5, %v4407_v13  ;;  %v860_v21 = vsel %vm850_vm3, %v827_v7, %v2909_v61  ;;  %vm539_vm8 = vcmp.eq.s32.totalorder %v4212_v55, %v465_v17  ;;  %3173 = vmatprep.mubr.f32.mxu1 %v1155_v15  ;;  %3348 = vmatmul.mubr.f32.gmra.mrb[6].mxu0 %v1163_v54  ;;  %v625_v0 = vpop.permute.xlu0 %624 }
  0xb6   :  { %v949_v1 = vsel %vm920_vm5, %v860_v21, 0  ;;  %vm699_vm9 = vcmp.eq.s32.totalorder %v4212_v55, %v625_v0  ;;  %v1164_v52 = vsub.f32 %v4391_v57, %v1163_v54 }
  0xb7   :  { %v4424_v31 = vand.u32 4294901760, %v949_v1  ;;  %vm731_vm10 = vmor %vm539_vm8, %vm699_vm9  ;;  %v1173_v59 = vand.u32 4294901760, %v4412_v20 }
  0xb8   :  { %v2910_v11 = vsel %vm731_vm10, 1.0, %v5012_v62  ;;  %v468_v36 = vpop.permute.xlu1 %467  ;;  %v1165_v38 = vand.u32 4294901760, %v1164_v52 }
  0xb9   :  { %v4429_v51 = vsub.f32 %v949_v1, %v4424_v31  ;;  %v861_v48 = vsel %vm850_vm3, %v828_v30, %v2910_v11  ;;  %vm540_vm11 = vcmp.eq.s32.totalorder %v4212_v55, %v468_v36  ;;  %3350 = vmatprep.mubr.f32.mxu0 %v1173_v59  ;;  %v628_v14 = vpop.permute.xlu0 %627  ;;  %v1174_v53 = vsub.f32 %v4412_v20, %v1173_v59  ;;  %v3893_v1 = vld [vmem:[%s5008_s0 + $0x60] sm:$0xff] }
  0xba   :  { %v952_v24 = vsel %vm920_vm5, %v861_v48, 0  ;;  %3174 = vmatmul.mubr.f32.gmra.mrb[6].mxu1 %v1165_v38  ;;  %vm700_vm12 = vcmp.eq.s32.totalorder %v4212_v55, %v628_v14  ;;  %v830_v23 = vsel %vm817_vm1, %v3893_v1, 0.0 }
  0xbb   :  { %v4441_v5 = vand.u32 4294901760, %v952_v24  ;;  %vm732_vm13 = vmor %vm540_vm11, %vm700_vm12  ;;  %v1175_v6 = vand.u32 4294901760, %v1174_v53  ;;  %v1183_v7 = vand.u32 4294901760, %v4429_v51 }
  0xbc   :  { %v2911_v15 = vsel %vm732_vm13, 1.0, %v5012_v62  ;;  %v471_v54 = vpop.permute.xlu1 %470 }
  0xbd   :  { %v4446_v61 = vsub.f32 %v952_v24, %v4441_v5  ;;  %v862_v17 = vsel %vm850_vm3, %v829_v4, %v2911_v15  ;;  %vm541_vm14 = vcmp.eq.s32.totalorder %v4212_v55, %v471_v54  ;;  %3176 = vmatprep.mubr.f32.mxu1 %v1175_v6  ;;  %3351 = vmatmul.mubr.f32.gmra.mrb[8].mxu0 %v1183_v7  ;;  %v631_v21 = vpop.permute.xlu0 %630  ;;  %v3894_v4 = vld [vmem:[%s5008_s0 + $0x68] sm:$0xff] }
  0xbe   :  { %v955_v0 = vsel %vm920_vm5, %v862_v17, 0  ;;  %vm701_vm15 = vcmp.eq.s32.totalorder %v4212_v55, %v631_v21  ;;  %v1184_v30 = vsub.f32 %v4429_v51, %v1183_v7  ;;  %v831_v6 = vsel %vm817_vm1, %v3894_v4, 0.0 }
  0xbf   :  { %5032 = vst [vmem:[#allocation5_spill] sm:$0xff] %v4446_v61  ;;  %v4458_v52 = vand.u32 4294901760, %v955_v0  ;;  %vm733_vm0 = vmor %vm541_vm14, %vm701_vm15  ;;  %v1193_v59 = vand.u32 4294901760, %v4446_v61 }
  0xc0   :  { %v2912_v11 = vsel %vm733_vm0, 1.0, %v5012_v62  ;;  %v474_v36 = vpop.permute.xlu1 %473  ;;  %v1185_v38 = vand.u32 4294901760, %v1184_v30 }
  0xc1   :  { %v4463_v48 = vsub.f32 %v955_v0, %v4458_v52  ;;  %v863_v14 = vsel %vm850_vm3, %v830_v23, %v2912_v11  ;;  %vm542_vm2 = vcmp.eq.s32.totalorder %v4212_v55, %v474_v36  ;;  %3353 = vmatprep.mubr.f32.mxu0 %v1193_v59  ;;  %v634_v53 = vpop.permute.xlu0 %633  ;;  %v1194_v24 = vsub.f32 %v4446_v61, %v1193_v59  ;;  %v3895_v59 = vld [vmem:[%s5008_s0 + $0x70] sm:$0xff] }
  0xc2   :  { %v958_v2 = vsel %vm920_vm5, %v863_v14, 0  ;;  %3177 = vmatmul.mubr.f32.gmra.mrb[8].mxu1 %v1185_v38  ;;  %vm702_vm4 = vcmp.eq.s32.totalorder %v4212_v55, %v634_v53  ;;  %v832_v11 = vsel %vm817_vm1, %v3895_v59, 0.0 }
  0xc3   :  { %5033 = vst [vmem:[#allocation6_spill] sm:$0xff] %v4463_v48  ;;  %v4475_v7 = vand.u32 4294901760, %v958_v2  ;;  %vm734_vm6 = vmor %vm542_vm2, %vm702_vm4  ;;  %v1195_v15 = vand.u32 4294901760, %v1194_v24  ;;  %v1203_v54 = vand.u32 4294901760, %v4463_v48 }
  0xc4   :  { %v2913_v17 = vsel %vm734_vm6, 1.0, %v5012_v62  ;;  %v477_v21 = vpop.permute.xlu1 %476 }
  0xc5   :  { %v4480_v0 = vsub.f32 %v958_v2, %v4475_v7  ;;  %v864_v1 = vsel %vm850_vm3, %v831_v6, %v2913_v17  ;;  %vm543_vm7 = vcmp.eq.s32.totalorder %v4212_v55, %v477_v21  ;;  %3179 = vmatprep.mubr.f32.mxu1 %v1195_v15  ;;  %3354 = vmatmul.mubr.f32.gmra.mrb[10].mxu0 %v1203_v54  ;;  %v637_v23 = vpop.permute.xlu0 %636  ;;  %v3896_v21 = vld [vmem:[%s5008_s0 + $0x78] sm:$0xff] }
  0xc6   :  { %v961_v30 = vsel %vm920_vm5, %v864_v1, 0  ;;  %vm703_vm8 = vcmp.eq.s32.totalorder %v4212_v55, %v637_v23  ;;  %v1204_v36 = vsub.f32 %v4463_v48, %v1203_v54  ;;  %v833_v1 = vsel %vm817_vm1, %v3896_v21, 0.0 }
  0xc7   :  { %5034 = vst [vmem:[#allocation7_spill] sm:$0xff] %v4480_v0  ;;  %v4492_v38 = vand.u32 4294901760, %v961_v30  ;;  %vm735_vm9 = vmor %vm543_vm7, %vm703_vm8  ;;  %v1213_v14 = vand.u32 4294901760, %v4480_v0 }
  0xc8   :  { %v2914_v53 = vsel %vm735_vm9, 1.0, %v5012_v62  ;;  %v480_v24 = vpop.permute.xlu1 %479  ;;  %v1205_v2 = vand.u32 4294901760, %v1204_v36 }
  0xc9   :  { %v4497_v4 = vsub.f32 %v961_v30, %v4492_v38  ;;  %v865_v6 = vsel %vm850_vm3, %v832_v11, %v2914_v53  ;;  %vm544_vm10 = vcmp.eq.s32.totalorder %v4212_v55, %v480_v24  ;;  %3356 = vmatprep.mubr.f32.mxu0 %v1213_v14  ;;  %v640_v15 = vpop.permute.xlu0 %639  ;;  %v1214_v54 = vsub.f32 %v4480_v0, %v1213_v14 }
  0xca   :  { %v964_v17 = vsel %vm920_vm5, %v865_v6, 0  ;;  %3180 = vmatmul.mubr.f32.gmra.mrb[10].mxu1 %v1205_v2  ;;  %vm704_vm11 = vcmp.eq.s32.totalorder %v4212_v55, %v640_v15  ;;  %v3897_v6 = vld [vmem:[%s5008_s0 + $0x80] sm:$0xff] }
  0xcb   :  { %5035 = vst [vmem:[#allocation8_spill] sm:$0xff] %v4497_v4  ;;  %v4509_v23 = vand.u32 4294901760, %v964_v17  ;;  %vm736_vm12 = vmor %vm544_vm10, %vm704_vm11  ;;  %v1215_v30 = vand.u32 4294901760, %v1214_v54  ;;  %v1223_v59 = vand.u32 4294901760, %v4497_v4  ;;  %v834_v15 = vsel %vm817_vm1, %v3897_v6, 0.0 }
  0xcc   :  { %v2915_v11 = vsel %vm736_vm12, 1.0, %v5012_v62  ;;  %v483_v36 = vpop.permute.xlu1 %482 }
  0xcd   :  { %v4514_v14 = vsub.f32 %v964_v17, %v4509_v23  ;;  %v866_v53 = vsel %vm850_vm3, %v833_v1, %v2915_v11  ;;  %vm545_vm13 = vcmp.eq.s32.totalorder %v4212_v55, %v483_v36  ;;  %3182 = vmatprep.mubr.f32.mxu1 %v1215_v30  ;;  %3357 = vmatmul.mubr.f32.gmra.mrb[12].mxu0 %v1223_v59  ;;  %v643_v24 = vpop.permute.xlu0 %642 }
  0xce   :  { %v967_v2 = vsel %vm920_vm5, %v866_v53, 0  ;;  %vm705_vm14 = vcmp.eq.s32.totalorder %v4212_v55, %v643_v24  ;;  %v1224_v54 = vsub.f32 %v4497_v4, %v1223_v59 }
  0xcf   :  { %5036 = vst [vmem:[#allocation9_spill] sm:$0xff] %v4514_v14  ;;  %v4526_v17 = vand.u32 4294901760, %v967_v2  ;;  %vm737_vm15 = vmor %vm545_vm13, %vm705_vm14  ;;  %v1233_v21 = vand.u32 4294901760, %v4514_v14 }
  0xd0   :  { %v2916_v1 = vsel %vm737_vm15, 1.0, %v5012_v62  ;;  %v486_v30 = vpop.permute.xlu1 %485  ;;  %v1225_v11 = vand.u32 4294901760, %v1224_v54  ;;  %v3898_v62 = vld [vmem:[%s5008_s0 + $0x88] sm:$0xff] }
  0xd1   :  { %v4531_v36 = vsub.f32 %v967_v2, %v4526_v17  ;;  %v867_v53 = vsel %vm850_vm3, %v834_v15, %v2916_v1  ;;  %vm546_vm0 = vcmp.eq.s32.totalorder %v4212_v55, %v486_v30  ;;  %3359 = vmatprep.mubr.f32.mxu0 %v1233_v21  ;;  %v646_v24 = vpop.permute.xlu0 %645  ;;  %v1234_v59 = vsub.f32 %v4514_v14, %v1233_v21 }
  0xd2   :  { %v970_v6 = vsel %vm920_vm5, %v867_v53, 0  ;;  %3183 = vmatmul.mubr.f32.gmra.mrb[12].mxu1 %v1225_v11  ;;  %v835_v54 = vsel %vm817_vm1, %v3898_v62, 0.0  ;;  %vm706_vm2 = vcmp.eq.s32.totalorder %v4212_v55, %v646_v24  ;;  %v5038_v30 = vmov 0.0  }
  0xd3   :  { %5037 = vst [vmem:[#allocation10_spill] sm:$0xff] %v4531_v36  ;;  %v4543_v2 = vand.u32 4294901760, %v970_v6  ;;  %vm738_vm4 = vmor %vm546_vm0, %vm706_vm2  ;;  %v1235_v15 = vand.u32 4294901760, %v1234_v59  ;;  %v1243_v1 = vand.u32 4294901760, %v4531_v36  ;;  %v3899_v59 = vld [vmem:[%s5008_s0 + $0x90] sm:$0xff] }
  0xd4   :  { %v2917_v4 = vsel %vm738_vm4, 1.0, %v5038_v30  ;;  %v489_v21 = vpop.permute.xlu1 %488  ;;  %v836_v14 = vsel %vm817_vm1, %v3899_v59, 0.0 }
  0xd5   :  { %v4548_v53 = vsub.f32 %v970_v6, %v4543_v2  ;;  %v868_v11 = vsel %vm850_vm3, %v835_v54, %v2917_v4  ;;  %vm547_vm6 = vcmp.eq.s32.totalorder %v4212_v55, %v489_v21  ;;  %3185 = vmatprep.mubr.f32.mxu1 %v1235_v15  ;;  %3360 = vmatmul.mubr.f32.gmra.mrb[14].mxu0 %v1243_v1  ;;  %v649_v62 = vpop.permute.xlu0 %648 }
  0xd6   :  { %v973_v24 = vsel %vm920_vm5, %v868_v11, 0  ;;  %vm707_vm7 = vcmp.eq.s32.totalorder %v4212_v55, %v649_v62  ;;  %v1244_v6 = vsub.f32 %v4531_v36, %v1243_v1 }
  0xd7   :  { %5039 = vst [vmem:[#allocation11_spill] sm:$0xff] %v4548_v53  ;;  %v4560_v0 = vand.u32 4294901760, %v973_v24  ;;  %vm739_vm8 = vmor %vm547_vm6, %vm707_vm7  ;;  %v1253_v4 = vand.u32 4294901760, %v4548_v53 }
  0xd8   :  { %v2918_v54 = vsel %vm739_vm8, 1.0, %v5038_v30  ;;  %v492_v15 = vpop.permute.xlu1 %491  ;;  %v1245_v21 = vand.u32 4294901760, %v1244_v6 }
  0xd9   :  { %v4565_v11 = vsub.f32 %v973_v24, %v4560_v0  ;;  %v869_v48 = vsel %vm850_vm3, %v836_v14, %v2918_v54  ;;  %vm548_vm1 = vcmp.eq.s32.totalorder %v4212_v55, %v492_v15  ;;  %3362 = vmatprep.mubr.f32.mxu0 %v1253_v4  ;;  %v652_v62 = vpop.permute.xlu0 %651  ;;  %v1254_v1 = vsub.f32 %v4548_v53, %v1253_v4 }
  0xda   :  { %v976_v59 = vsel %vm920_vm5, %v869_v48, 0  ;;  %3186 = vmatmul.mubr.f32.gmra.mrb[14].mxu1 %v1245_v21  ;;  %vm708_vm9 = vcmp.eq.s32.totalorder %v4212_v55, %v652_v62 }
  0xdb   :  { %5040 = vst [vmem:[#allocation12_spill] sm:$0xff] %v4565_v11  ;;  %v4573_v36 = vand.u32 4294901760, %v976_v59  ;;  %vm740_vm10 = vmor %vm548_vm1, %vm708_vm9  ;;  %v1255_v6 = vand.u32 4294901760, %v1254_v1  ;;  %v1263_v24 = vand.u32 4294901760, %v4565_v11 }
  0xdc   :  { %v2919_v61 = vsel %vm740_vm10, 1.0, %v5038_v30  ;;  %v495_v14 = vpop.permute.xlu1 %494 }
  0xdd   :  { %v4578_v54 = vsub.f32 %v976_v59, %v4573_v36  ;;  %v870_v4 = vsel %vm850_vm3, %v4145_v35, %v2919_v61  ;;  %vm549_vm11 = vcmp.eq.s32.totalorder %v4212_v55, %v495_v14  ;;  %3188 = vmatprep.mubr.f32.mxu1 %v1255_v6  ;;  %3363 = vmatmul.mubr.f32.gmra.mrb[16].mxu0 %v1263_v24  ;;  %v655_v48 = vpop.permute.xlu0 %654 }
  0xde   :  { %v979_v15 = vsel %vm920_vm5, %v870_v4, 0  ;;  %vm709_vm12 = vcmp.eq.s32.totalorder %v4212_v55, %v655_v48  ;;  %v1264_v21 = vsub.f32 %v4565_v11, %v1263_v24 }
  0xdf   :  { %5041 = vst [vmem:[#allocation13_spill] sm:$0xff] %v4578_v54  ;;  %v4587_v62 = vand.u32 4294901760, %v979_v15  ;;  %vm741_vm13 = vmor %vm549_vm11, %vm709_vm12  ;;  %v1273_v1 = vand.u32 4294901760, %v4578_v54 }
  0xe0   :  { %v2920_v59 = vsel %vm741_vm13, 1.0, %v5038_v30  ;;  %v498_v53 = vpop.permute.xlu1 %497  ;;  %v1265_v35 = vand.u32 4294901760, %v1264_v21 }
  0xe1   :  { %v4592_v61 = vsub.f32 %v979_v15, %v4587_v62  ;;  %v871_v6 = vsel %vm850_vm3, %v4154_v39, %v2920_v59  ;;  %vm550_vm14 = vcmp.eq.s32.totalorder %v4212_v55, %v498_v53  ;;  %3365 = vmatprep.mubr.f32.mxu0 %v1273_v1  ;;  %v658_v24 = vpop.permute.xlu0 %657  ;;  %v1274_v14 = vsub.f32 %v4578_v54, %v1273_v1 }
  0xe2   :  { %v982_v4 = vsel %vm920_vm5, %v871_v6, 0  ;;  %3189 = vmatmul.mubr.f32.gmra.mrb[16].mxu1 %v1265_v35  ;;  %vm710_vm15 = vcmp.eq.s32.totalorder %v4212_v55, %v658_v24 }
  0xe3   :  { %5042 = vst [vmem:[#allocation14_spill] sm:$0xff] %v4592_v61  ;;  %v4601_v48 = vand.u32 4294901760, %v982_v4  ;;  %vm742_vm0 = vmor %vm550_vm14, %vm710_vm15  ;;  %v1275_v15 = vand.u32 4294901760, %v1274_v14  ;;  %v1283_v21 = vand.u32 4294901760, %v4592_v61 }
  0xe4   :  { %v2921_v11 = vsel %vm742_vm0, 1.0, %v5038_v30  ;;  %v501_v39 = vpop.permute.xlu1 %500 }
  0xe5   :  { %v4606_v53 = vsub.f32 %v982_v4, %v4601_v48  ;;  %v872_v1 = vsel %vm850_vm3, %v4158_v40, %v2921_v11  ;;  %vm551_vm2 = vcmp.eq.s32.totalorder %v4212_v55, %v501_v39  ;;  %3191 = vmatprep.mubr.f32.mxu1 %v1275_v15  ;;  %3366 = vmatmul.mubr.f32.gmra.mrb[18].mxu0 %v1283_v21  ;;  %v661_v59 = vpop.permute.xlu0 %660 }
  0xe6   :  { %v985_v35 = vsel %vm920_vm5, %v872_v1, 0  ;;  %vm711_vm4 = vcmp.eq.s32.totalorder %v4212_v55, %v661_v59  ;;  %v1284_v6 = vsub.f32 %v4592_v61, %v1283_v21 }
  0xe7   :  { %5043 = vst [vmem:[#allocation15_spill] sm:$0xff] %v4606_v53  ;;  %v4615_v24 = vand.u32 4294901760, %v985_v35  ;;  %vm743_vm6 = vmor %vm551_vm2, %vm711_vm4  ;;  %v1293_v14 = vand.u32 4294901760, %v4606_v53 }
  0xe8   :  { %v2922_v4 = vsel %vm743_vm6, 1.0, %v5038_v30  ;;  %v504_v54 = vpop.permute.xlu1 %503  ;;  %v1285_v40 = vand.u32 4294901760, %v1284_v6 }
  0xe9   :  { %v4620_v11 = vsub.f32 %v985_v35, %v4615_v24  ;;  %v873_v15 = vsel %vm850_vm3, %v4162_v41, %v2922_v4  ;;  %vm552_vm7 = vcmp.eq.s32.totalorder %v4212_v55, %v504_v54  ;;  %3368 = vmatprep.mubr.f32.mxu0 %v1293_v14  ;;  %v664_v21 = vpop.permute.xlu0 %663  ;;  %v1294_v39 = vsub.f32 %v4606_v53, %v1293_v14 }
  0xea   :  { %v988_v1 = vsel %vm920_vm5, %v873_v15, 0  ;;  %3192 = vmatmul.mubr.f32.gmra.mrb[18].mxu1 %v1285_v40  ;;  %vm712_vm8 = vcmp.eq.s32.totalorder %v4212_v55, %v664_v21 }
  0xeb   :  { %5044 = vst [vmem:[#allocation16_spill] sm:$0xff] %v4620_v11  ;;  %v4629_v59 = vand.u32 4294901760, %v988_v1  ;;  %vm744_vm1 = vmor %vm552_vm7, %vm712_vm8  ;;  %v1295_v35 = vand.u32 4294901760, %v1294_v39  ;;  %v1303_v6 = vand.u32 4294901760, %v4620_v11 }
  0xec   :  { %v2923_v61 = vsel %vm744_vm1, 1.0, %v5038_v30  ;;  %v507_v41 = vpop.permute.xlu1 %506 }
  0xed   :  { %v4634_v54 = vsub.f32 %v988_v1, %v4629_v59  ;;  %v874_v14 = vsel %vm850_vm3, %v4168_v42, %v2923_v61  ;;  %vm553_vm9 = vcmp.eq.s32.totalorder %v4212_v55, %v507_v41  ;;  %3194 = vmatprep.mubr.f32.mxu1 %v1295_v35  ;;  %3369 = vmatmul.mubr.f32.gmra.mrb[20].mxu0 %v1303_v6  ;;  %v667_v4 = vpop.permute.xlu0 %666 }
  0xee   :  { %v991_v40 = vsel %vm920_vm5, %v874_v14, 0  ;;  %vm713_vm10 = vcmp.eq.s32.totalorder %v4212_v55, %v667_v4  ;;  %v1304_v15 = vsub.f32 %v4620_v11, %v1303_v6 }
  0xef   :  { %5045 = vst [vmem:[#allocation17_spill] sm:$0xff] %v4634_v54  ;;  %v4643_v21 = vand.u32 4294901760, %v991_v40  ;;  %vm745_vm11 = vmor %vm553_vm9, %vm713_vm10  ;;  %v1313_v39 = vand.u32 4294901760, %v4634_v54 }
  0xf0   :  { %v2924_v1 = vsel %vm745_vm11, 1.0, %v5038_v30  ;;  %v510_v53 = vpop.permute.xlu1 %509  ;;  %v1305_v42 = vand.u32 4294901760, %v1304_v15 }
  0xf1   :  { %v4648_v61 = vsub.f32 %v991_v40, %v4643_v21  ;;  %v875_v35 = vsel %vm850_vm3, %v4172_v3, %v2924_v1  ;;  %vm554_vm12 = vcmp.eq.s32.totalorder %v4212_v55, %v510_v53  ;;  %3371 = vmatprep.mubr.f32.mxu0 %v1313_v39  ;;  %v670_v6 = vpop.permute.xlu0 %669  ;;  %v1314_v41 = vsub.f32 %v4634_v54, %v1313_v39 }
  0xf2   :  { %v994_v14 = vsel %vm920_vm5, %v875_v35, 0  ;;  %3195 = vmatmul.mubr.f32.gmra.mrb[20].mxu1 %v1305_v42  ;;  %vm714_vm13 = vcmp.eq.s32.totalorder %v4212_v55, %v670_v6 }
  0xf3   :  { %5046 = vst [vmem:[#allocation18_spill] sm:$0xff] %v4648_v61  ;;  %v4657_v4 = vand.u32 4294901760, %v994_v14  ;;  %vm746_vm14 = vmor %vm554_vm12, %vm714_vm13  ;;  %v1315_v40 = vand.u32 4294901760, %v1314_v41  ;;  %v1323_v15 = vand.u32 4294901760, %v4648_v61 }
  0xf4   :  { %v2925_v11 = vsel %vm746_vm14, 1.0, %v5038_v30  ;;  %v513_v3 = vpop.permute.xlu1 %512 }
  0xf5   :  { %v4662_v53 = vsub.f32 %v994_v14, %v4657_v4  ;;  %v876_v39 = vsel %vm850_vm3, %v4176_v43, %v2925_v11  ;;  %vm555_vm15 = vcmp.eq.s32.totalorder %v4212_v55, %v513_v3  ;;  %3197 = vmatprep.mubr.f32.mxu1 %v1315_v40  ;;  %3372 = vmatmul.mubr.f32.gmra.mrb[22].mxu0 %v1323_v15  ;;  %v673_v1 = vpop.permute.xlu0 %672 }
  0xf6   :  { %v997_v42 = vsel %vm920_vm5, %v876_v39, 0  ;;  %vm715_vm0 = vcmp.eq.s32.totalorder %v4212_v55, %v673_v1  ;;  %v1324_v35 = vsub.f32 %v4648_v61, %v1323_v15 }
  0xf7   :  { %5047 = vst [vmem:[#allocation19_spill] sm:$0xff] %v4662_v53  ;;  %v4671_v6 = vand.u32 4294901760, %v997_v42  ;;  %vm747_vm2 = vmor %vm555_vm15, %vm715_vm0  ;;  %v1333_v41 = vand.u32 4294901760, %v4662_v53 }
  0xf8   :  { %v2926_v14 = vsel %vm747_vm2, 1.0, %v5038_v30  ;;  %v516_v54 = vpop.permute.xlu1 %515  ;;  %v1325_v43 = vand.u32 4294901760, %v1324_v35 }
  0xf9   :  { %v4676_v11 = vsub.f32 %v997_v42, %v4671_v6  ;;  %v877_v40 = vsel %vm850_vm3, %v4182_v46, %v2926_v14  ;;  %vm556_vm4 = vcmp.eq.s32.totalorder %v4212_v55, %v516_v54  ;;  %3374 = vmatprep.mubr.f32.mxu0 %v1333_v41  ;;  %v676_v15 = vpop.permute.xlu0 %675  ;;  %v1334_v3 = vsub.f32 %v4662_v53, %v1333_v41 }
  0xfa   :  { %v1000_v39 = vsel %vm920_vm5, %v877_v40, 0  ;;  %3198 = vmatmul.mubr.f32.gmra.mrb[22].mxu1 %v1325_v43  ;;  %vm716_vm6 = vcmp.eq.s32.totalorder %v4212_v55, %v676_v15 }
  0xfb   :  { %5048 = vst [vmem:[#allocation20_spill] sm:$0xff] %v4676_v11  ;;  %v4685_v1 = vand.u32 4294901760, %v1000_v39  ;;  %vm748_vm7 = vmor %vm556_vm4, %vm716_vm6  ;;  %v1335_v42 = vand.u32 4294901760, %v1334_v3  ;;  %v1343_v35 = vand.u32 4294901760, %v4676_v11 }
  0xfc   :  { %v2927_v61 = vsel %vm748_vm7, 1.0, %v5038_v30  ;;  %v519_v46 = vpop.permute.xlu1 %518 }
  0xfd   :  { %v4690_v54 = vsub.f32 %v1000_v39, %v4685_v1  ;;  %v878_v41 = vsel %vm850_vm3, %v4188_v63, %v2927_v61  ;;  %vm557_vm8 = vcmp.eq.s32.totalorder %v4212_v55, %v519_v46  ;;  %3200 = vmatprep.mubr.f32.mxu1 %v1335_v42  ;;  %3375 = vmatmul.mubr.f32.gmra.mrb[24].mxu0 %v1343_v35  ;;  %v679_v14 = vpop.permute.xlu0 %678 }
  0xfe   :  { %v1003_v43 = vsel %vm920_vm5, %v878_v41, 0  ;;  %vm717_vm1 = vcmp.eq.s32.totalorder %v4212_v55, %v679_v14  ;;  %v1344_v40 = vsub.f32 %v4676_v11, %v1343_v35 }
  0xff   :  { %5049 = vst [vmem:[#allocation21_spill] sm:$0xff] %v4690_v54  ;;  %v4699_v15 = vand.u32 4294901760, %v1003_v43  ;;  %vm749_vm9 = vmor %vm557_vm8, %vm717_vm1  ;;  %v1353_v3 = vand.u32 4294901760, %v4690_v54 }
 0x100   :  { %v2928_v39 = vsel %vm749_vm9, 1.0, %v5038_v30  ;;  %v522_v53 = vpop.permute.xlu1 %521  ;;  %v1345_v63 = vand.u32 4294901760, %v1344_v40 }
 0x101   :  { %v4704_v61 = vsub.f32 %v1003_v43, %v4699_v15  ;;  %v879_v42 = vsel %vm850_vm3, %v4192_v25, %v2928_v39  ;;  %vm558_vm10 = vcmp.eq.s32.totalorder %v4212_v55, %v522_v53  ;;  %3377 = vmatprep.mubr.f32.mxu0 %v1353_v3  ;;  %v682_v35 = vpop.permute.xlu0 %681  ;;  %v1354_v46 = vsub.f32 %v4690_v54, %v1353_v3 }
 0x102   :  { %v1006_v41 = vsel %vm920_vm5, %v879_v42, 0  ;;  %3201 = vmatmul.mubr.f32.gmra.mrb[24].mxu1 %v1345_v63  ;;  %vm718_vm11 = vcmp.eq.s32.totalorder %v4212_v55, %v682_v35 }
 0x103   :  { %5050 = vst [vmem:[#allocation22_spill] sm:$0xff] %v4704_v61  ;;  %v4713_v14 = vand.u32 4294901760, %v1006_v41  ;;  %vm750_vm12 = vmor %vm558_vm10, %vm718_vm11  ;;  %v1355_v43 = vand.u32 4294901760, %v1354_v46  ;;  %v1363_v40 = vand.u32 4294901760, %v4704_v61 }
 0x104   :  { %v2929_v11 = vsel %vm750_vm12, 1.0, %v5038_v30  ;;  %v525_v25 = vpop.permute.xlu1 %524 }
 0x105   :  { %v4718_v53 = vsub.f32 %v1006_v41, %v4713_v14  ;;  %v880_v3 = vsel %vm850_vm3, %v4196_v47, %v2929_v11  ;;  %vm559_vm13 = vcmp.eq.s32.totalorder %v4212_v55, %v525_v25  ;;  %3203 = vmatprep.mubr.f32.mxu1 %v1355_v43  ;;  %3378 = vmatmul.mubr.f32.gmra.mrb[26].mxu0 %v1363_v40  ;;  %v685_v39 = vpop.permute.xlu0 %684 }
 0x106   :  { %v1009_v63 = vsel %vm920_vm5, %v880_v3, 0  ;;  %vm719_vm14 = vcmp.eq.s32.totalorder %v4212_v55, %v685_v39  ;;  %v1364_v42 = vsub.f32 %v4704_v61, %v1363_v40 }
 0x107   :  { %v4727_v35 = vand.u32 4294901760, %v1009_v63  ;;  %vm751_vm15 = vmor %vm559_vm13, %vm719_vm14  ;;  %v1373_v46 = vand.u32 4294901760, %v4718_v53 }
 0x108   :  { %v2930_v41 = vsel %vm751_vm15, 1.0, %v5038_v30  ;;  %v528_v54 = vpop.permute.xlu1 %527  ;;  %v1365_v47 = vand.u32 4294901760, %v1364_v42 }
 0x109   :  { %v4732_v11 = vsub.f32 %v1009_v63, %v4727_v35  ;;  %v881_v43 = vsel %vm850_vm3, %v4207_v58, %v2930_v41  ;;  %vm560_vm0 = vcmp.eq.s32.totalorder %v4212_v55, %v528_v54  ;;  %3380 = vmatprep.mubr.f32.mxu0 %v1373_v46  ;;  %v688_v40 = vpop.permute.xlu0 %687  ;;  %v1374_v25 = vsub.f32 %v4718_v53, %v1373_v46 }
 0x10a   :  { %v1012_v3 = vsel %vm920_vm5, %v881_v43, 0  ;;  %3204 = vmatmul.mubr.f32.gmra.mrb[26].mxu1 %v1365_v47  ;;  %vm720_vm2 = vcmp.eq.s32.totalorder %v4212_v55, %v688_v40 }
 0x10b   :  { %v4741_v39 = vand.u32 4294901760, %v1012_v3  ;;  %vm752_vm4 = vmor %vm560_vm0, %vm720_vm2  ;;  %v1375_v63 = vand.u32 4294901760, %v1374_v25  ;;  %v1383_v42 = vand.u32 4294901760, %v4732_v11 }
 0x10c   :  { %v2931_v61 = vsel %vm752_vm4, 1.0, %v5038_v30 }
 0x10d   :  { %v4746_v58 = vsub.f32 %v1012_v3, %v4741_v39  ;;  %v882_v54 = vsel %vm850_vm3, %v4217_v56, %v2931_v61  ;;  %3206 = vmatprep.mubr.f32.mxu1 %v1375_v63  ;;  %3381 = vmatmul.mubr.f32.gmra.mrb[28].mxu0 %v1383_v42  ;;  %v1384_v46 = vsub.f32 %v4732_v11, %v1383_v42  ;;  %v894_v42 = vld [vmem:[%s5010_s2 + $0x30] sm:$0xff] }
 0x10e   :  { %v1015_v41 = vsel %vm920_vm5, %v882_v54, 0 }
 0x10f   :  { %v4753_v47 = vand.u32 4294901760, %v1015_v41  ;;  %v1385_v43 = vand.u32 4294901760, %v1384_v46  ;;  %v1393_v40 = vand.u32 4294901760, %v4746_v58 }
 0x111   :  { %v4757_v30 = vsub.f32 %v1015_v41, %v4753_v47  ;;  %3207 = vmatmul.mubr.f32.gmra.mrb[28].mxu1 %v1385_v43  ;;  %3383 = vmatprep.mubr.f32.mxu0 %v1393_v40  ;;  %v1394_v25 = vsub.f32 %v4746_v58, %v1393_v40 }
 0x113   :  { %v1395_v55 = vand.u32 4294901760, %v1394_v25  ;;  %v1403_v56 = vand.u32 4294901760, %v4757_v30 }
 0x115   :  { %3209 = vmatprep.mubr.f32.mxu1 %v1395_v55  ;;  %3384 = vmatmul.mubr.f32.gmra.mrb[30].mxu0 %v1403_v56  ;;  %v1404_v61 = vsub.f32 %v4757_v30, %v1403_v56  ;;  %v896_v55 = vld [vmem:[%s5010_s2 + $0x40] sm:$0xff] }
 0x116   :  { %3396 = vmatprep.mubr.f32.mxu0 %v4275_v19 }
 0x117   :  { %v1405_v3 = vand.u32 4294901760, %v1404_v61 }
 0x119   :  { %3210 = vmatmul.mubr.f32.gmra.mrb[30].mxu1 %v1405_v3  ;;  %3397 = vmatmul.mubr.f32.vlgmr.msra.gmra.mrb[0].mxu0 %v4248_v9 }
 0x11a   :  { %3222 = vmatprep.mubr.f32.mxu1 %v4275_v19  ;;  %3399 = vmatprep.mubr.f32.mxu0 %v4267_v29 }
 0x11b   :  { %3545 = vmatpush3.bf16.msra.mxu0 %v4126_v26  ;;  %v5051_v26 = vld [vmem:[#allocation5_spill] sm:$0xff] }
 0x11c   :  { %3547 = vmatprep.subr.bf16.mxu0 %v4132_v27 }
 0x11d   :  { %3223 = vmatmul.mubr.f32.vlgmr.msra.gmra.mrb[0].mxu1 %v4248_v9  ;;  %3400 = vmatmul.mubr.f32.gmra.mrb[2].mxu0 %v4301_v32 }
 0x11e   :  { %3521 = vmatpush3.bf16.msra.mxu1 %v4369_v33  ;;  %3225 = vmatprep.mubr.f32.mxu1 %v4267_v29  ;;  %v5068_v33 = vld [vmem:[#allocation22_spill] sm:$0xff] }
 0x11f   :  { %3402 = vmatprep.mubr.f32.mxu0 %v4323_v22  ;;  %3523 = vmatprep.subr.bf16.mxu1 %v4405_v10 }
 0x120   :  { %3549 = vmatpush3.bf16.msra.mxu0 %v4132_v27  ;;  %v5052_v27 = vld [vmem:[#allocation6_spill] sm:$0xff] }
 0x121   :  { %3226 = vmatmul.mubr.f32.gmra.mrb[2].mxu1 %v4301_v32  ;;  %3403 = vmatmul.mubr.f32.gmra.mrb[4].mxu0 %v4343_v28 }
 0x122   :  { %3228 = vmatprep.mubr.f32.mxu1 %v4323_v22  ;;  %3405 = vmatprep.mubr.f32.mxu0 %v4362_v18 }
 0x123   :  { %3525 = vmatpush3.bf16.msra.mxu1 %v4405_v10  ;;  %3452 = vmatprep.subr.mxu0 %v4141_v34  ;;  %v888_v10 = vld [vmem:[%s5010_s2] sm:$0xff] }
 0x124   :  { %3278 = vmatprep.subr.mxu1 %v4286_v50  ;;  %3453 = vmatpush3.msra.mxu0 %v4141_v34  ;;  %v5053_v34 = vld [vmem:[#allocation7_spill] sm:$0xff] }
 0x125   :  { %3229 = vmatmul.mubr.f32.gmra.mrb[4].mxu1 %v4343_v28  ;;  %3406 = vmatmul.mubr.f32.gmra.mrb[6].mxu0 %v4385_v37 }
 0x126   :  { %3231 = vmatprep.mubr.f32.mxu1 %v4362_v18  ;;  %3408 = vmatprep.mubr.f32.mxu0 %v4407_v13 }
 0x127   :  { %3279 = vmatpush3.msra.mxu1 %v4286_v50  ;;  %v5059_v50 = vld [vmem:[#allocation13_spill] sm:$0xff] }
 0x129   :  { %3232 = vmatmul.mubr.f32.gmra.mrb[6].mxu1 %v4385_v37  ;;  %3409 = vmatmul.mubr.f32.gmra.mrb[8].mxu0 %v4424_v31 }
 0x12a   :  { %3234 = vmatprep.mubr.f32.mxu1 %v4407_v13  ;;  %3411 = vmatprep.mubr.f32.mxu0 %v4441_v5 }
 0x12d   :  { %3235 = vmatmul.mubr.f32.gmra.mrb[8].mxu1 %v4424_v31  ;;  %3412 = vmatmul.mubr.f32.gmra.mrb[10].mxu0 %v4458_v52 }
 0x12e   :  { %3237 = vmatprep.mubr.f32.mxu1 %v4441_v5  ;;  %3414 = vmatprep.mubr.f32.mxu0 %v4475_v7 }
 0x131   :  { %3238 = vmatmul.mubr.f32.gmra.mrb[10].mxu1 %v4458_v52  ;;  %3415 = vmatmul.mubr.f32.gmra.mrb[12].mxu0 %v4492_v38 }
 0x132   :  { %3240 = vmatprep.mubr.f32.mxu1 %v4475_v7  ;;  %3417 = vmatprep.mubr.f32.mxu0 %v4509_v23 }
 0x135   :  { %3241 = vmatmul.mubr.f32.gmra.mrb[12].mxu1 %v4492_v38  ;;  %3418 = vmatmul.mubr.f32.gmra.mrb[14].mxu0 %v4526_v17 }
 0x136   :  { %3243 = vmatprep.mubr.f32.mxu1 %v4509_v23  ;;  %3420 = vmatprep.mubr.f32.mxu0 %v4543_v2 }
 0x139   :  { %3244 = vmatmul.mubr.f32.gmra.mrb[14].mxu1 %v4526_v17  ;;  %3421 = vmatmul.mubr.f32.gmra.mrb[16].mxu0 %v4560_v0 }
 0x13a   :  { %3246 = vmatprep.mubr.f32.mxu1 %v4543_v2  ;;  %3423 = vmatprep.mubr.f32.mxu0 %v4573_v36 }
 0x13d   :  { %3247 = vmatmul.mubr.f32.gmra.mrb[16].mxu1 %v4560_v0  ;;  %3424 = vmatmul.mubr.f32.gmra.mrb[18].mxu0 %v4587_v62 }
 0x13e   :  { %3249 = vmatprep.mubr.f32.mxu1 %v4573_v36  ;;  %3426 = vmatprep.mubr.f32.mxu0 %v4601_v48 }
 0x141   :  { %3250 = vmatmul.mubr.f32.gmra.mrb[18].mxu1 %v4587_v62  ;;  %3427 = vmatmul.mubr.f32.gmra.mrb[20].mxu0 %v4615_v24 }
 0x142   :  { %3252 = vmatprep.mubr.f32.mxu1 %v4601_v48  ;;  %3429 = vmatprep.mubr.f32.mxu0 %v4629_v59 }
 0x145   :  { %3253 = vmatmul.mubr.f32.gmra.mrb[20].mxu1 %v4615_v24  ;;  %3430 = vmatmul.mubr.f32.gmra.mrb[22].mxu0 %v4643_v21 }
 0x146   :  { %3255 = vmatprep.mubr.f32.mxu1 %v4629_v59  ;;  %3432 = vmatprep.mubr.f32.mxu0 %v4657_v4 }
 0x149   :  { %3256 = vmatmul.mubr.f32.gmra.mrb[22].mxu1 %v4643_v21  ;;  %3433 = vmatmul.mubr.f32.gmra.mrb[24].mxu0 %v4671_v6 }
 0x14a   :  { %3258 = vmatprep.mubr.f32.mxu1 %v4657_v4  ;;  %3435 = vmatprep.mubr.f32.mxu0 %v4685_v1 }
 0x14d   :  { %3259 = vmatmul.mubr.f32.gmra.mrb[24].mxu1 %v4671_v6  ;;  %3436 = vmatmul.mubr.f32.gmra.mrb[26].mxu0 %v4699_v15 }
 0x14e   :  { %3261 = vmatprep.mubr.f32.mxu1 %v4685_v1  ;;  %3438 = vmatprep.mubr.f32.mxu0 %v4713_v14 }
 0x151   :  { %3262 = vmatmul.mubr.f32.gmra.mrb[26].mxu1 %v4699_v15  ;;  %3439 = vmatmul.mubr.f32.gmra.mrb[28].mxu0 %v4727_v35 }
 0x152   :  { %3264 = vmatprep.mubr.f32.mxu1 %v4713_v14  ;;  %3441 = vmatprep.mubr.f32.mxu0 %v4741_v39 }
 0x155   :  { %3265 = vmatmul.mubr.f32.gmra.mrb[28].mxu1 %v4727_v35  ;;  %3442 = vmatmul.mubr.f32.gmra.mrb[30].mxu0 %v4753_v47 }
 0x156   :  { %3267 = vmatprep.mubr.f32.mxu1 %v4741_v39  ;;  %3454 = vmatprep.mubr.f32.mxu0 %v4275_v19  ;;  %v5057_v19 = vld [vmem:[#allocation11_spill] sm:$0xff] }
 0x159   :  { %3268 = vmatmul.mubr.f32.gmra.mrb[30].mxu1 %v4753_v47  ;;  %3455 = vmatmul.mubr.f32.vlgmr.msra.gmra.mrb[0].mxu0 %v4248_v9  ;;  %v5054_v9 = vld [vmem:[#allocation8_spill] sm:$0xff] }
 0x15a   :  { %3280 = vmatprep.mubr.f32.mxu1 %v4296_v60  ;;  %3457 = vmatprep.mubr.f32.mxu0 %v4267_v29  ;;  %v5056_v29 = vld [vmem:[#allocation10_spill] sm:$0xff] }
 0x15b   :  { %v5060_v60 = vld [vmem:[#allocation14_spill] sm:$0xff] }
 0x15d   :  { %3281 = vmatmul.mubr.f32.vlgmr.msra.gmra.mrb[0].mxu1 %v4258_v16  ;;  %3458 = vmatmul.mubr.f32.gmra.mrb[2].mxu0 %v4301_v32  ;;  %v5055_v16 = vld [vmem:[#allocation9_spill] sm:$0xff]  ;;  %v5061_v32 = vld [vmem:[#allocation15_spill] sm:$0xff] }
 0x15e   :  { %3283 = vmatprep.mubr.f32.mxu1 %v4280_v45  ;;  %3460 = vmatprep.mubr.f32.mxu0 %v4323_v22  ;;  %v5058_v45 = vld [vmem:[#allocation12_spill] sm:$0xff]  ;;  %v5063_v22 = vld [vmem:[#allocation17_spill] sm:$0xff] }
 0x161   :  { %3284 = vmatmul.mubr.f32.gmra.mrb[2].mxu1 %v4311_v12  ;;  %3461 = vmatmul.mubr.f32.gmra.mrb[4].mxu0 %v4343_v28  ;;  %v5062_v12 = vld [vmem:[#allocation16_spill] sm:$0xff]  ;;  %v5065_v28 = vld [vmem:[#allocation19_spill] sm:$0xff] }
 0x162   :  { %3286 = vmatprep.mubr.f32.mxu1 %v4331_v49  ;;  %3463 = vmatprep.mubr.f32.mxu0 %v4362_v18  ;;  %v5064_v49 = vld [vmem:[#allocation18_spill] sm:$0xff]  ;;  %v5067_v18 = vld [vmem:[#allocation21_spill] sm:$0xff] }
 0x165   :  { %3287 = vmatmul.mubr.f32.gmra.mrb[4].mxu1 %v4349_v8  ;;  %3464 = vmatmul.mubr.f32.gmra.mrb[6].mxu0 %v4385_v37  ;;  %v5066_v8 = vld [vmem:[#allocation20_spill] sm:$0xff] }
 0x166   :  { %3289 = vmatprep.mubr.f32.mxu1 %v4372_v44  ;;  %3466 = vmatprep.mubr.f32.mxu0 %v4407_v13 }
 0x169   :  { %3290 = vmatmul.mubr.f32.gmra.mrb[6].mxu1 %v4391_v57  ;;  %3467 = vmatmul.mubr.f32.gmra.mrb[8].mxu0 %v4424_v31  ;;  %v889_v57 = vld [vmem:[%s5010_s2 + $0x8] sm:$0xff] }
 0x16a   :  { %3292 = vmatprep.mubr.f32.mxu1 %v4412_v20  ;;  %3469 = vmatprep.mubr.f32.mxu0 %v4441_v5 }
 0x16d   :  { %3293 = vmatmul.mubr.f32.gmra.mrb[8].mxu1 %v4429_v51  ;;  %3470 = vmatmul.mubr.f32.gmra.mrb[10].mxu0 %v4458_v52 }
 0x16e   :  { %3295 = vmatprep.mubr.f32.mxu1 %v5051_v26  ;;  %3472 = vmatprep.mubr.f32.mxu0 %v4475_v7  ;;  %v891_v7 = vld [vmem:[%s5010_s2 + $0x18] sm:$0xff] }
 0x171   :  { %3296 = vmatmul.mubr.f32.gmra.mrb[10].mxu1 %v5052_v27  ;;  %3473 = vmatmul.mubr.f32.gmra.mrb[12].mxu0 %v4492_v38  ;;  %v890_v38 = vld [vmem:[%s5010_s2 + $0x10] sm:$0xff] }
 0x172   :  { %3298 = vmatprep.mubr.f32.mxu1 %v5053_v34  ;;  %3475 = vmatprep.mubr.f32.mxu0 %v4509_v23 }
 0x175   :  { %3299 = vmatmul.mubr.f32.gmra.mrb[12].mxu1 %v5054_v9  ;;  %3476 = vmatmul.mubr.f32.gmra.mrb[14].mxu0 %v4526_v17 }
 0x176   :  { %3301 = vmatprep.mubr.f32.mxu1 %v5055_v16  ;;  %3478 = vmatprep.mubr.f32.mxu0 %v4543_v2  ;;  %v899_v16 = vld [vmem:[%s5010_s2 + $0x58] sm:$0xff] }
 0x179   :  { %3302 = vmatmul.mubr.f32.gmra.mrb[14].mxu1 %v5056_v29  ;;  %3479 = vmatmul.mubr.f32.gmra.mrb[16].mxu0 %v4560_v0 }
 0x17a   :  { %3304 = vmatprep.mubr.f32.mxu1 %v5057_v19  ;;  %3481 = vmatprep.mubr.f32.mxu0 %v4573_v36  ;;  %v898_v19 = vld [vmem:[%s5010_s2 + $0x50] sm:$0xff] }
 0x17d   :  { %3305 = vmatmul.mubr.f32.gmra.mrb[16].mxu1 %v5058_v45  ;;  %3482 = vmatmul.mubr.f32.gmra.mrb[18].mxu0 %v4587_v62 }
 0x17e   :  { %3307 = vmatprep.mubr.f32.mxu1 %v5059_v50  ;;  %3484 = vmatprep.mubr.f32.mxu0 %v4601_v48 }
 0x181   :  { %3308 = vmatmul.mubr.f32.gmra.mrb[18].mxu1 %v5060_v60  ;;  %3485 = vmatmul.mubr.f32.gmra.mrb[20].mxu0 %v4615_v24 }
 0x182   :  { %3310 = vmatprep.mubr.f32.mxu1 %v5061_v32  ;;  %3487 = vmatprep.mubr.f32.mxu0 %v4629_v59  ;;  %v893_v59 = vld [vmem:[%s5010_s2 + $0x28] sm:$0xff] }
 0x185   :  { %3311 = vmatmul.mubr.f32.gmra.mrb[20].mxu1 %v5062_v12  ;;  %3488 = vmatmul.mubr.f32.gmra.mrb[22].mxu0 %v4643_v21 }
 0x186   :  { %3313 = vmatprep.mubr.f32.mxu1 %v5063_v22  ;;  %3490 = vmatprep.mubr.f32.mxu0 %v4657_v4  ;;  %v892_v4 = vld [vmem:[%s5010_s2 + $0x20] sm:$0xff] }
 0x189   :  { %3314 = vmatmul.mubr.f32.gmra.mrb[22].mxu1 %v5064_v49  ;;  %3491 = vmatmul.mubr.f32.gmra.mrb[24].mxu0 %v4671_v6 }
 0x18a   :  { %3316 = vmatprep.mubr.f32.mxu1 %v5065_v28  ;;  %3493 = vmatprep.mubr.f32.mxu0 %v4685_v1  ;;  %v901_v28 = vld [vmem:[%s5010_s2 + $0x68] sm:$0xff] }
 0x18d   :  { %3317 = vmatmul.mubr.f32.gmra.mrb[24].mxu1 %v5066_v8  ;;  %3494 = vmatmul.mubr.f32.gmra.mrb[26].mxu0 %v4699_v15 }
 0x18e   :  { %3319 = vmatprep.mubr.f32.mxu1 %v5067_v18  ;;  %3496 = vmatprep.mubr.f32.mxu0 %v4713_v14  ;;  %v900_v18 = vld [vmem:[%s5010_s2 + $0x60] sm:$0xff] }
 0x191   :  { %3320 = vmatmul.mubr.f32.gmra.mrb[26].mxu1 %v5068_v33  ;;  %3497 = vmatmul.mubr.f32.gmra.mrb[28].mxu0 %v4727_v35 }
 0x192   :  { %3322 = vmatprep.mubr.f32.mxu1 %v4718_v53  ;;  %3499 = vmatprep.mubr.f32.mxu0 %v4741_v39  ;;  %v895_v39 = vld [vmem:[%s5010_s2 + $0x38] sm:$0xff] }
 0x195   :  { %3323 = vmatmul.mubr.f32.gmra.mrb[28].mxu1 %v4732_v11  ;;  %3500 = vmatmul.mubr.f32.gmra.mrb[30].mxu0 %v4753_v47 }
 0x196   :  { %3325 = vmatprep.mubr.f32.mxu1 %v4746_v58 }
 0x199   :  { %3326 = vmatmul.mubr.f32.gmra.mrb[30].mxu1 %v4757_v30  ;;  %v897_v30 = vld [vmem:[%s5010_s2 + $0x48] sm:$0xff] }
 0x22c   :  { %v3456_v44 = vpop.f32.mrb[0].mxu0 }
 0x22d   :  { %v2662_v37 = vpop.f32.mrb[1].mxu0 }
 0x230   :  { %v3282_v13 = vpop.f32.mrb[0].mxu1  ;;  %v3459_v20 = vpop.f32.mrb[2].mxu0 }
 0x231   :  { %v3550_v31 = vadd.f32 %v3282_v13, %v889_v57  ;;  %v1771_v51 = vpop.f32.mrb[1].mxu1  ;;  %v2674_v5 = vpop.f32.mrb[3].mxu0 }
 0x232   :  { %v3552_v52 = vadd.f32 %v1771_v51, %v888_v10 }
 0x233   :  { %v3551_v0 = vadd.f32 %v3550_v31, %v3456_v44  ;;  %v903_v31 = vld [vmem:[%s5010_s2 + $0x78] sm:$0xff] }
 0x234   :  { %v3553_v23 = vadd.f32 %v3552_v52, %v2662_v37  ;;  %v3285_v17 = vpop.f32.mrb[2].mxu1  ;;  %v3462_v36 = vpop.f32.mrb[4].mxu0 }
 0x235   :  { %2853 = vst [vmem:[#allocation2 + $0x8] sm:$0xff] %v3551_v0  ;;  %v3554_v2 = vadd.f32 %v3285_v17, %v891_v7  ;;  %v1785_v62 = vpop.f32.mrb[3].mxu1  ;;  %v2686_v48 = vpop.f32.mrb[5].mxu0 }
 0x236   :  { %2852 = vst [vmem:[#allocation2] sm:$0xff] %v3553_v23  ;;  %v3556_v24 = vadd.f32 %v1785_v62, %v890_v38 }
 0x237   :  { %v3555_v21 = vadd.f32 %v3554_v2, %v3459_v20  ;;  %v905_v2 = vld [vmem:[%s5010_s2 + $0x88] sm:$0xff] }
 0x238   :  { %v3557_v6 = vadd.f32 %v3556_v24, %v2674_v5  ;;  %v3288_v1 = vpop.f32.mrb[4].mxu1  ;;  %v3465_v15 = vpop.f32.mrb[6].mxu0  ;;  %v902_v5 = vld [vmem:[%s5010_s2 + $0x70] sm:$0xff] }
 0x239   :  { %2855 = vst [vmem:[#allocation2 + $0x18] sm:$0xff] %v3555_v21  ;;  %v3558_v14 = vadd.f32 %v3288_v1, %v893_v59  ;;  %v1799_v53 = vpop.f32.mrb[5].mxu1  ;;  %v2698_v35 = vpop.f32.mrb[7].mxu0 }
 0x23a   :  { %2854 = vst [vmem:[#allocation2 + $0x10] sm:$0xff] %v3557_v6  ;;  %v3560_v11 = vadd.f32 %v1799_v53, %v892_v4 }
 0x23b   :  { %v3559_v63 = vadd.f32 %v3558_v14, %v3462_v36  ;;  %v907_v14 = vld [vmem:[%s5010_s2 + $0x98] sm:$0xff] }
 0x23c   :  { %v3561_v58 = vadd.f32 %v3560_v11, %v2686_v48  ;;  %v3291_v54 = vpop.f32.mrb[6].mxu1  ;;  %v3468_v46 = vpop.f32.mrb[8].mxu0  ;;  %v904_v48 = vld [vmem:[%s5010_s2 + $0x80] sm:$0xff] }
 0x23d   :  { %2857 = vst [vmem:[#allocation2 + $0x28] sm:$0xff] %v3559_v63  ;;  %v3562_v41 = vadd.f32 %v3291_v54, %v895_v39  ;;  %v1813_v47 = vpop.f32.mrb[7].mxu1  ;;  %v2710_v43 = vpop.f32.mrb[9].mxu0 }
 0x23e   :  { %2856 = vst [vmem:[#allocation2 + $0x20] sm:$0xff] %v3561_v58  ;;  %v3564_v40 = vadd.f32 %v1813_v47, %v894_v42 }
 0x23f   :  { %v3563_v25 = vadd.f32 %v3562_v41, %v3465_v15  ;;  %v909_v41 = vld [vmem:[%s5010_s2 + $0xa8] sm:$0xff] }
 0x240   :  { %v3565_v56 = vadd.f32 %v3564_v40, %v2698_v35  ;;  %v3294_v61 = vpop.f32.mrb[8].mxu1  ;;  %v3471_v3 = vpop.f32.mrb[10].mxu0  ;;  %v906_v35 = vld [vmem:[%s5010_s2 + $0x90] sm:$0xff] }
 0x241   :  { %2859 = vst [vmem:[#allocation2 + $0x38] sm:$0xff] %v3563_v25  ;;  %v3566_v26 = vadd.f32 %v3294_v61, %v897_v30  ;;  %v1827_v27 = vpop.f32.mrb[9].mxu1  ;;  %v2722_v34 = vpop.f32.mrb[11].mxu0 }
 0x242   :  { %2858 = vst [vmem:[#allocation2 + $0x30] sm:$0xff] %v3565_v56  ;;  %v3568_v9 = vadd.f32 %v1827_v27, %v896_v55 }
 0x243   :  { %v3567_v29 = vadd.f32 %v3566_v26, %v3468_v46  ;;  %v911_v26 = vld [vmem:[%s5010_s2 + $0xb8] sm:$0xff] }
 0x244   :  { %v3569_v45 = vadd.f32 %v3568_v9, %v2710_v43  ;;  %v3297_v50 = vpop.f32.mrb[10].mxu1  ;;  %v3474_v60 = vpop.f32.mrb[12].mxu0  ;;  %v908_v43 = vld [vmem:[%s5010_s2 + $0xa0] sm:$0xff] }
 0x245   :  { %2861 = vst [vmem:[#allocation2 + $0x48] sm:$0xff] %v3567_v29  ;;  %v3570_v32 = vadd.f32 %v3297_v50, %v899_v16  ;;  %v1841_v12 = vpop.f32.mrb[11].mxu1  ;;  %v2734_v22 = vpop.f32.mrb[13].mxu0 }
 0x246   :  { %2860 = vst [vmem:[#allocation2 + $0x40] sm:$0xff] %v3569_v45  ;;  %v3572_v49 = vadd.f32 %v1841_v12, %v898_v19 }
 0x247   :  { %v3571_v8 = vadd.f32 %v3570_v32, %v3471_v3  ;;  %v913_v32 = vld [vmem:[%s5010_s2 + $0xc8] sm:$0xff] }
 0x248   :  { %v3573_v33 = vadd.f32 %v3572_v49, %v2722_v34  ;;  %v3300_v44 = vpop.f32.mrb[12].mxu1  ;;  %v3477_v37 = vpop.f32.mrb[14].mxu0  ;;  %v910_v34 = vld [vmem:[%s5010_s2 + $0xb0] sm:$0xff] }
 0x249   :  { %2863 = vst [vmem:[#allocation2 + $0x58] sm:$0xff] %v3571_v8  ;;  %v3574_v57 = vadd.f32 %v3300_v44, %v901_v28  ;;  %v1855_v10 = vpop.f32.mrb[13].mxu1  ;;  %v2746_v13 = vpop.f32.mrb[15].mxu0 }
 0x24a   :  { %2862 = vst [vmem:[#allocation2 + $0x50] sm:$0xff] %v3573_v33  ;;  %v3576_v20 = vadd.f32 %v1855_v10, %v900_v18 }
 0x24b   :  { %v3575_v51 = vadd.f32 %v3574_v57, %v3474_v60  ;;  %v915_v57 = vld [vmem:[%s5010_s2 + $0xd8] sm:$0xff] }
 0x24c   :  { %v3577_v52 = vadd.f32 %v3576_v20, %v2734_v22  ;;  %v3303_v7 = vpop.f32.mrb[14].mxu1  ;;  %v3480_v0 = vpop.f32.mrb[16].mxu0  ;;  %v912_v22 = vld [vmem:[%s5010_s2 + $0xc0] sm:$0xff] }
 0x24d   :  { %2865 = vst [vmem:[#allocation2 + $0x68] sm:$0xff] %v3575_v51  ;;  %v3578_v38 = vadd.f32 %v3303_v7, %v903_v31  ;;  %v1869_v23 = vpop.f32.mrb[15].mxu1  ;;  %v2758_v17 = vpop.f32.mrb[17].mxu0 }
 0x24e   :  { %2864 = vst [vmem:[#allocation2 + $0x60] sm:$0xff] %v3577_v52  ;;  %v3580_v36 = vadd.f32 %v1869_v23, %v902_v5 }
 0x24f   :  { %v3579_v62 = vadd.f32 %v3578_v38, %v3477_v37  ;;  %v917_v38 = vld [vmem:[%s5010_s2 + $0xe8] sm:$0xff] }
 0x250   :  { %v3581_v24 = vadd.f32 %v3580_v36, %v2746_v13  ;;  %v3306_v59 = vpop.f32.mrb[16].mxu1  ;;  %v3483_v21 = vpop.f32.mrb[18].mxu0  ;;  %v914_v13 = vld [vmem:[%s5010_s2 + $0xd0] sm:$0xff] }
 0x251   :  { %2867 = vst [vmem:[#allocation2 + $0x78] sm:$0xff] %v3579_v62  ;;  %v3582_v4 = vadd.f32 %v3306_v59, %v905_v2  ;;  %v1883_v6 = vpop.f32.mrb[17].mxu1  ;;  %v2770_v1 = vpop.f32.mrb[19].mxu0 }
 0x252   :  { %2866 = vst [vmem:[#allocation2 + $0x70] sm:$0xff] %v3581_v24  ;;  %v3584_v15 = vadd.f32 %v1883_v6, %v904_v48 }
 0x253   :  { %v3583_v53 = vadd.f32 %v3582_v4, %v3480_v0  ;;  %v919_v4 = vld [vmem:[%s5010_s2 + $0xf8] sm:$0xff] }
 0x254   :  { %v3585_v11 = vadd.f32 %v3584_v15, %v2758_v17  ;;  %v3309_v39 = vpop.f32.mrb[18].mxu1  ;;  %v3486_v63 = vpop.f32.mrb[20].mxu0  ;;  %v916_v17 = vld [vmem:[%s5010_s2 + $0xe0] sm:$0xff] }
 0x255   :  { %2869 = vst [vmem:[#allocation2 + $0x88] sm:$0xff] %v3583_v53  ;;  %v3586_v42 = vadd.f32 %v3309_v39, %v907_v14  ;;  %v1897_v58 = vpop.f32.mrb[19].mxu1  ;;  %v2782_v54 = vpop.f32.mrb[21].mxu0 }
 0x256   :  { %2868 = vst [vmem:[#allocation2 + $0x80] sm:$0xff] %v3585_v11  ;;  %v3588_v46 = vadd.f32 %v1897_v58, %v906_v35 }
 0x257   :  { %v3587_v47 = vadd.f32 %v3586_v42, %v3483_v21 }
 0x258   :  { %v3589_v40 = vadd.f32 %v3588_v46, %v2770_v1  ;;  %v3312_v30 = vpop.f32.mrb[20].mxu1  ;;  %v3489_v25 = vpop.f32.mrb[22].mxu0  ;;  %v918_v1 = vld [vmem:[%s5010_s2 + $0xf0] sm:$0xff] }
 0x259   :  { %2871 = vst [vmem:[#allocation2 + $0x98] sm:$0xff] %v3587_v47  ;;  %v3590_v55 = vadd.f32 %v3312_v30, %v909_v41  ;;  %v1911_v56 = vpop.f32.mrb[21].mxu1  ;;  %v2794_v61 = vpop.f32.mrb[23].mxu0 }
 0x25a   :  { %2870 = vst [vmem:[#allocation2 + $0x90] sm:$0xff] %v3589_v40  ;;  %v3592_v3 = vadd.f32 %v1911_v56, %v908_v43 }
 0x25b   :  { %v3591_v27 = vadd.f32 %v3590_v55, %v3486_v63 }
 0x25c   :  { %v3593_v9 = vadd.f32 %v3592_v3, %v2782_v54  ;;  %v3315_v16 = vpop.f32.mrb[22].mxu1  ;;  %v3492_v29 = vpop.f32.mrb[24].mxu0 }
 0x25d   :  { %2873 = vst [vmem:[#allocation2 + $0xa8] sm:$0xff] %v3591_v27  ;;  %v3594_v19 = vadd.f32 %v3315_v16, %v911_v26  ;;  %v1925_v45 = vpop.f32.mrb[23].mxu1  ;;  %v2806_v50 = vpop.f32.mrb[25].mxu0 }
 0x25e   :  { %2872 = vst [vmem:[#allocation2 + $0xa0] sm:$0xff] %v3593_v9  ;;  %v3596_v60 = vadd.f32 %v1925_v45, %v910_v34 }
 0x25f   :  { %v3595_v12 = vadd.f32 %v3594_v19, %v3489_v25 }
 0x260   :  { %v3597_v49 = vadd.f32 %v3596_v60, %v2794_v61  ;;  %v3318_v28 = vpop.f32.mrb[24].mxu1  ;;  %v3495_v8 = vpop.f32.mrb[26].mxu0 }
 0x261   :  { %2875 = vst [vmem:[#allocation2 + $0xb8] sm:$0xff] %v3595_v12  ;;  %v3598_v18 = vadd.f32 %v3318_v28, %v913_v32  ;;  %v1939_v33 = vpop.f32.mrb[25].mxu1  ;;  %v2818_v44 = vpop.f32.mrb[27].mxu0 }
 0x262   :  { %2874 = vst [vmem:[#allocation2 + $0xb0] sm:$0xff] %v3597_v49  ;;  %v3600_v37 = vadd.f32 %v1939_v33, %v912_v22 }
 0x263   :  { %v3599_v10 = vadd.f32 %v3598_v18, %v3492_v29 }
 0x264   :  { %v3601_v20 = vadd.f32 %v3600_v37, %v2806_v50  ;;  %v3321_v31 = vpop.f32.mrb[26].mxu1  ;;  %v3498_v51 = vpop.f32.mrb[28].mxu0 }
 0x265   :  { %2877 = vst [vmem:[#allocation2 + $0xc8] sm:$0xff] %v3599_v10  ;;  %v3602_v5 = vadd.f32 %v3321_v31, %v915_v57  ;;  %v1953_v52 = vpop.f32.mrb[27].mxu1  ;;  %v2830_v7 = vpop.f32.mrb[29].mxu0 }
 0x266   :  { %2876 = vst [vmem:[#allocation2 + $0xc0] sm:$0xff] %v3601_v20  ;;  %v3604_v0 = vadd.f32 %v1953_v52, %v914_v13 }
 0x267   :  { %v3603_v23 = vadd.f32 %v3602_v5, %v3495_v8 }
 0x268   :  { %v3605_v36 = vadd.f32 %v3604_v0, %v2818_v44  ;;  %v3324_v2 = vpop.f32.mrb[28].mxu1  ;;  %v3501_v62 = vpop.f32.mrb[30].mxu0 }
 0x269   :  { %2879 = vst [vmem:[#allocation2 + $0xd8] sm:$0xff] %v3603_v23  ;;  %v3606_v48 = vadd.f32 %v3324_v2, %v917_v38  ;;  %v1967_v24 = vpop.f32.mrb[29].mxu1  ;;  %v2842_v59 = vpop.f32.mrb[31].mxu0 }
 0x26a   :  { %2878 = vst [vmem:[#allocation2 + $0xd0] sm:$0xff] %v3605_v36  ;;  %v3608_v21 = vadd.f32 %v1967_v24, %v916_v17 }
 0x26b   :  { %v3607_v6 = vadd.f32 %v3606_v48, %v3498_v51 }
 0x26c   :  { %v3609_v15 = vadd.f32 %v3608_v21, %v2830_v7  ;;  %v3327_v14 = vpop.f32.mrb[30].mxu1 }
 0x26d   :  { %2881 = vst [vmem:[#allocation2 + $0xe8] sm:$0xff] %v3607_v6  ;;  %v3610_v53 = vadd.f32 %v3327_v14, %v919_v4  ;;  %v1981_v35 = vpop.f32.mrb[31].mxu1 }
 0x26e   :  { %2880 = vst [vmem:[#allocation2 + $0xe0] sm:$0xff] %v3609_v15  ;;  %v3612_v11 = vadd.f32 %v1981_v35, %v918_v1 }
 0x26f   :  { %v3611_v39 = vadd.f32 %v3610_v53, %v3501_v62 }
 0x270   :  { %v3613_v63 = vadd.f32 %v3612_v11, %v2842_v59 }
 0x271   :  { %2883 = vst [vmem:[#allocation2 + $0xf8] sm:$0xff] %v3611_v39 }
 0x272   :  { %2882 = vst [vmem:[#allocation2 + $0xf0] sm:$0xff] %v3613_v63 }
 0x273   :  { %3911 = shalt.err (!%p3908_p4)
}
 0x274   :  { %s3912_s23 = scalar_lea.hbm %s5011_s3, 4096 }
 0x275   :  { %p3913_p5 = scmp.ne.s32.totalorder %s5011_s3, %s3912_s23  ;;  %p3916_p6 = scmp.lt.u32.totalorder %s3912_s23, %s5011_s3 }
 0x277   :  { %p3918_p7 = pnand %p3916_p6, %p3913_p5 }
 0x279   :  { %3921 = shalt.err (!%p3918_p7)
}
 0x27a   :  { %s3928_s28 = smov 128   ;;  %s3929_s29 = smov 8  }
 0x27b   :  { %2895 = dma.vmem_to_hbm [thread:$0]  %s2890_s20, 4096, %s5011_s3, [#allocation3], %s3928_s28, %s3928_s28, %s3929_s29  }
 0x27c   :  { %3922 = dma.done.wait [#allocation3], 4096  }
 0x27d   :  { %3923 = vsyncadd [#allocation3], 4294963200 }
 0x27e   :  { %2899 = vsyncpa [#allocation3], 1 }

</bundles_post_ra>
